<compile_context>
chip_gen: v7x
topology: tpu7x:2x2x1
jax: 0.10.0
libtpu: 0.0.40
codegen_flags: <defaults>
</compile_context>

<pallas_src>
import functools

import jax
import jax.numpy as jnp
from jax.experimental import pallas as pl
from jax.experimental.pallas import tpu as pltpu


# Static layer geometry (fixed by the module): out-channels of conv1..conv5.
_C_OUT = (256, 128, 64, 64, 10)
# In-channels of each slab-resident weight block (conv1 keeps only its 128
# point-feature columns here; its global-feature columns live in a separate
# f32 slab that is only used once per batch element).
_C_IN_SLAB = (128, 256, 128, 64, 64)
_ROW_OFF = (0, 256, 384, 448, 512)
_N_ROWS = 528            # conv5 padded 10 -> 16 rows (bf16 sublane aligned)
_NCOLS = 256             # max in-channels among slab-resident blocks
_PAD_BIAS = -1e30        # pad-row bias -> exp() underflows to exactly 0


def _kernel(points_ref, inp_ref, w_ref, w1g_ref, b_ref,
            logp_ref, pool_ref, gb_ref, hmax_ref, *, tn, n_valid):
    """One (batch b, point-tile n) grid step.

    points_ref : (1, 128, TN) f32   per-point features (channels on sublanes)
    inp_ref    : (1, 1, G)    f32   global feature row for this batch element
    w_ref      : (528, 256)   bf16  packed weight slab, VMEM-resident
    w1g_ref    : (256, G)     f32   conv1 global-feature columns
    b_ref      : (528, 1)     f32   packed bias column (pad rows = -1e30)
    logp_ref   : (1, 10, TN)  f32   log-softmax output tile (lane-dense)
    pool_ref   : (1, 64, 1)   f32   max over points of layer-4 activations
    gb_ref     : (256, 1)     f32   scratch: hoisted global-feature + bias term
    hmax_ref   : (64, TN)     f32   scratch: elementwise running max of h4
    """
    n = pl.program_id(1)
    n_last = pl.num_programs(1) - 1

    # ---- hoisted per-batch term: sum(W1g * g) + b1, computed once per b -----
    @pl.when(n == 0)
    def _():
        g = inp_ref[0]                                          # (1, G) f32
        gb_ref[...] = (jnp.sum(w1g_ref[...] * g, axis=1, keepdims=True)
                       + b_ref[0:256, :])                       # (256, 1) f32

    pts = points_ref[0].astype(jnp.bfloat16)                    # (128, TN)

    # ---- layer 1 (point-feature part on the MXU, global part from gb) -------
    h = jnp.dot(w_ref[0:256, 0:128], pts,
                preferred_element_type=jnp.float32)
    h = jnp.maximum(h + gb_ref[...], 0.0)                       # (256, TN) f32

    # ---- layer 2 -------------------------------------------------------------
    h = jnp.dot(w_ref[256:384, 0:256], h.astype(jnp.bfloat16),
                preferred_element_type=jnp.float32) + b_ref[256:384, :]
    h = jnp.maximum(h, 0.0)                                     # (128, TN)

    # ---- layer 3 -------------------------------------------------------------
    h = jnp.dot(w_ref[384:448, 0:128], h.astype(jnp.bfloat16),
                preferred_element_type=jnp.float32) + b_ref[384:448, :]
    h = jnp.maximum(h, 0.0)                                     # (64, TN)

    # ---- layer 4 (feeds both conv5 and the max-pool output) ------------------
    h4 = jnp.dot(w_ref[448:512, 0:64], h.astype(jnp.bfloat16),
                 preferred_element_type=jnp.float32) + b_ref[448:512, :]
    h4 = jnp.maximum(h4, 0.0)                                   # (64, TN)

    # ---- layer 5 (16 padded rows) + log-softmax over the 10 real channels ----
    logits = jnp.dot(w_ref[512:528, 0:64], h4.astype(jnp.bfloat16),
                     preferred_element_type=jnp.float32) + b_ref[512:528, :]
    m = jnp.max(logits, axis=0, keepdims=True)                  # pad rows never win
    z = logits - m
    lse = jnp.log(jnp.sum(jnp.exp(z), axis=0, keepdims=True))   # pad rows add 0
    logp_ref[0] = (z[0:10, :] - lse).astype(logp_ref.dtype)     # (10, TN)

    # ---- max-pool over points: elementwise running max in VMEM scratch -------
    h4p = h4
    if n_valid % tn != 0:   # static: padding exists only in this case
        col = n * tn + jax.lax.broadcasted_iota(jnp.int32, (1, tn), 1)
        h4p = jnp.where(col < n_valid, h4, 0.0)   # relu >= 0, so 0 is neutral

    @pl.when(n == 0)
    def _():
        hmax_ref[...] = h4p

    @pl.when(n != 0)
    def _():
        hmax_ref[...] = jnp.maximum(hmax_ref[...], h4p)

    @pl.when(n == n_last)
    def _():
        pool_ref[0] = jnp.max(hmax_ref[...], axis=1,
                              keepdims=True).astype(pool_ref.dtype)


def pack_params(params, feature_size):
    """Packs the five 1x1-conv weights/biases. Call ONCE, outside the hot path.

    Returns:
      w_slab : (528, 256)  bf16  stacked out-channel rows, zero-padded columns;
                                 conv5 padded to 16 rows (zero weights).
      w1g    : (256, 3*fs) f32   conv1 columns that multiply the global feature.
      b_slab : (528, 1)    f32   biases; conv5 pad rows get -1e30.
    """
    g_dim = 3 * feature_size
    w = jnp.zeros((_N_ROWS, _NCOLS), jnp.float32)
    b = jnp.full((_N_ROWS, 1), _PAD_BIAS, jnp.float32)
    w1g = None
    for i, name in enumerate(("conv1", "conv2", "conv3", "conv4", "conv5")):
        o = _C_OUT[i]
        wi = jnp.asarray(params[f"{name}.weight"], jnp.float32).reshape(o, -1)
        bi = jnp.asarray(params[f"{name}.bias"], jnp.float32).reshape(o)
        if i == 0:
            w1g = wi[:, 128:128 + g_dim]          # global-feature columns (f32)
            wi = wi[:, :128]                      # point-feature columns
        r = _ROW_OFF[i]
        w = w.at[r:r + o, :wi.shape[1]].set(wi)
        b = b.at[r:r + o, 0].set(bi)
    return w.astype(jnp.bfloat16), w1g, b


def _choose_tile_n(n_points):
    for t in (2048, 1024, 512, 256, 128):
        if n_points % t == 0:
            return t
    # No exact divisor: pick the largest tile <= N (wrapper pads N up to a
    # multiple of it); minimum lane-aligned tile is 128.
    for t in (2048, 1024, 512, 256, 128):
        if t <= n_points:
            return t
    return 128


@functools.partial(jax.jit, static_argnames=("feature_size",))
def point_prediction_forward(points_feature, inp_feature, w_slab, w1g, b_slab,
                             *, feature_size):
    """points_feature: (B, 128, N) f32, inp_feature: (B, 3*feature_size) f32.

    Returns (log_probs (B, 10, N), max_pool (B, 64)), matching the PyTorch
    module's forward.
    """
    B, c_pts, N = points_feature.shape
    assert c_pts == 128, "points_feature must have 128 channels"
    G = 3 * feature_size

    tn = _choose_tile_n(N)
    n_pad = pl.cdiv(N, tn) * tn
    if n_pad != N:
        points_feature = jnp.pad(points_feature,
                                 ((0, 0), (0, 0), (0, n_pad - N)))
    grid = (B, n_pad // tn)

    inp_row = inp_feature.reshape(B, 1, G)   # (B, G) -> (B, 1, G), free relayout
    kernel = functools.partial(_kernel, tn=tn, n_valid=N)

    logp, pool = pl.pallas_call(
        kernel,
        out_shape=(
            jax.ShapeDtypeStruct((B, 10, n_pad), jnp.float32),
            jax.ShapeDtypeStruct((B, 64, 1), jnp.float32),
        ),
        grid=grid,
        in_specs=[
            pl.BlockSpec((1, 128, tn), lambda b, n: (b, 0, n)),    # point tiles
            pl.BlockSpec((1, 1, G), lambda b, n: (b, 0, 0)),       # global feat
            pl.BlockSpec((_N_ROWS, _NCOLS), lambda b, n: (0, 0)),  # bf16 weights
            pl.BlockSpec((256, G), lambda b, n: (0, 0)),           # conv1 global W
            pl.BlockSpec((_N_ROWS, 1), lambda b, n: (0, 0)),       # biases
        ],
        out_specs=(
            pl.BlockSpec((1, 10, tn), lambda b, n: (b, 0, n)),     # log-probs
            pl.BlockSpec((1, 64, 1), lambda b, n: (b, 0, 0)),      # max-pool
        ),
        scratch_shapes=[
            pltpu.VMEM((256, 1), jnp.float32),    # hoisted gb term
            pltpu.VMEM((64, tn), jnp.float32),    # running elementwise max
        ],
        compiler_params=pltpu.CompilerParams(
            dimension_semantics=("parallel", "arbitrary"),
            vmem_limit_bytes=48 * 1024 * 1024),
    )(points_feature, inp_row, w_slab, w1g, b_slab)

    if n_pad != N:
        logp = logp[:, :, :N]
    return logp, pool[:, :, 0]


def init_params(key, feature_size):
    """PyTorch-style Conv2d(k=1) init: U(-1/sqrt(fan_in), +1/sqrt(fan_in))."""
    c_in = (128 + 3 * feature_size, 256, 128, 64, 64)
    params = {}
    for i, name in enumerate(("conv1", "conv2", "conv3", "conv4", "conv5")):
        key, kw, kb = jax.random.split(key, 3)
        bound = 1.0 / (c_in[i] ** 0.5)
        params[f"{name}.weight"] = jax.random.uniform(
            kw, (_C_OUT[i], c_in[i]), jnp.float32, minval=-bound, maxval=bound)
        params[f"{name}.bias"] = jax.random.uniform(
            kb, (_C_OUT[i],), jnp.float32, minval=-bound, maxval=bound)
    return params


def _reference_forward(points_feature, inp_feature, params, feature_size):
    """Plain-JAX reference matching the PyTorch module exactly."""
    B, _, N = points_feature.shape
    x = jnp.concatenate(
        [points_feature,
         jnp.broadcast_to(inp_feature[:, :, None],
                          (B, 3 * feature_size, N))], axis=1)

    def conv1x1(h, name):
        w = params[f"{name}.weight"]
        b = params[f"{name}.bias"]
        return (jnp.einsum("oi,bin->bon", w, h, precision="highest")
                + b[None, :, None])

    h = jax.nn.relu(conv1x1(x, "conv1"))
    h = jax.nn.relu(conv1x1(h, "conv2"))
    h = jax.nn.relu(conv1x1(h, "conv3"))
    h4 = jax.nn.relu(conv1x1(h, "conv4"))
    logits = conv1x1(h4, "conv5")
    logp = jax.nn.log_softmax(logits, axis=1)
    pool = jnp.max(h4, axis=2)
    return logp, pool


def _run_case(key, batch, n_points, feature_size):
    kp, kg, kparam = jax.random.split(key, 3)
    points = jax.random.normal(kp, (batch, 128, n_points), jnp.float32)
    glob = jax.random.normal(kg, (batch, 3 * feature_size), jnp.float32)
    params = init_params(kparam, feature_size)

    # Pack weights ONCE, outside the per-call hot path.
    w_slab, w1g, b_slab = pack_params(params, feature_size)

    logp, pool = point_prediction_forward(points, glob, w_slab, w1g, b_slab,
                                          feature_size=feature_size)
    logp, pool = jax.block_until_ready((logp, pool))

    ref_logp, ref_pool = _reference_forward(points, glob, params, feature_size)

    assert logp.shape == ref_logp.shape and logp.dtype == ref_logp.dtype
    assert pool.shape == ref_pool.shape and pool.dtype == ref_pool.dtype
    assert jnp.allclose(logp, ref_logp, atol=2e-3, rtol=2e-3), (
        float(jnp.max(jnp.abs(logp - ref_logp))))
    assert jnp.allclose(pool, ref_pool, atol=2e-3, rtol=2e-3), (
        float(jnp.max(jnp.abs(pool - ref_pool))))


if __name__ == "__main__":
    feature_size = 32          # small test config (module default is 128)
    key = jax.random.PRNGKey(0)
    k1, k2 = jax.random.split(key)

    # Exact-tiling path: N divisible by the tile size.
    _run_case(k1, batch=2, n_points=384, feature_size=feature_size)
    # Padded path: N not a multiple of 128 -> wrapper pads, kernel masks pool.
    _run_case(k2, batch=1, n_points=200, feature_size=feature_size)

    print("KERNEL_OK")
</pallas_src>

<mosaic_0001>
module attributes {stable_mosaic.version = 11 : i64} {
  func.func @_kernel(%arg0: i32, %arg1: i32, %arg2: memref<1x128x128xf32, #tpu.memory_space<vmem>>, %arg3: memref<1x1x96xf32, #tpu.memory_space<vmem>>, %arg4: memref<528x256xbf16, #tpu.memory_space<vmem>>, %arg5: memref<256x96xf32, #tpu.memory_space<vmem>>, %arg6: memref<528x1xf32, #tpu.memory_space<vmem>>, %arg7: memref<1x10x128xf32, #tpu.memory_space<vmem>>, %arg8: memref<1x64x1xf32, #tpu.memory_space<vmem>>, %arg9: memref<256x1xf32, #tpu.memory_space<vmem>>, %arg10: memref<64x128xf32, #tpu.memory_space<vmem>>) attributes {dimension_semantics = [#tpu.dimension_semantics<parallel>, #tpu.dimension_semantics<arbitrary>], iteration_bounds = array<i64: 2, 3>, scalar_prefetch = 0 : i64, scratch_operands = 2 : i64, tpu.core_type = #tpu.core_type<tc>, window_params = [{transform_indices = @transform_0, window_bounds = array<i64: 1, 128, 128>}, {transform_indices = @transform_1, window_bounds = array<i64: 1, 1, 96>}, {pipeline_mode = #tpu.pipeline_mode<synchronous>, transform_indices = @transform_2, window_bounds = array<i64: 528, 256>}, {pipeline_mode = #tpu.pipeline_mode<synchronous>, transform_indices = @transform_3, window_bounds = array<i64: 256, 96>}, {pipeline_mode = #tpu.pipeline_mode<synchronous>, transform_indices = @transform_4, window_bounds = array<i64: 528, 1>}, {transform_indices = @transform_5, window_bounds = array<i64: 1, 10, 128>}, {transform_indices = @transform_6, window_bounds = array<i64: 1, 64, 1>}]} {
    %c0_i32 = arith.constant 0 : i32
    %0 = arith.cmpi eq, %arg1, %c0_i32 : i32
    %1 = arith.extui %0 : i1 to i32
    %c0_i32_0 = arith.constant 0 : i32
    %2 = arith.cmpi ne, %1, %c0_i32_0 : i32
    scf.if %2 {
      %c0_37 = arith.constant 0 : index
      %c0_38 = arith.constant 0 : index
      %c0_39 = arith.constant 0 : index
      %66 = vector.load %arg3[%c0_37, %c0_38, %c0_39] : memref<1x1x96xf32, #tpu.memory_space<vmem>>, vector<1x1x96xf32>
      %67 = vector.shape_cast %66 : vector<1x1x96xf32> to vector<1x96xf32>
      %c0_40 = arith.constant 0 : index
      %c0_41 = arith.constant 0 : index
      %68 = vector.load %arg5[%c0_40, %c0_41] : memref<256x96xf32, #tpu.memory_space<vmem>>, vector<256x96xf32>
      %69 = vector.broadcast %67 : vector<1x96xf32> to vector<256x96xf32>
      %70 = arith.mulf %68, %69 : vector<256x96xf32>
      %cst_42 = arith.constant dense<0.000000e+00> : vector<256xf32>
      %71 = vector.multi_reduction <add>, %70, %cst_42 [1] : vector<256x96xf32> to vector<256xf32>
      %72 = vector.shape_cast %71 : vector<256xf32> to vector<256x1xf32>
      %c0_43 = arith.constant 0 : index
      %c0_44 = arith.constant 0 : index
      %73 = vector.load %arg6[%c0_43, %c0_44] : memref<528x1xf32, #tpu.memory_space<vmem>>, vector<256x1xf32>
      %74 = arith.addf %72, %73 : vector<256x1xf32>
      %c0_45 = arith.constant 0 : index
      %c0_46 = arith.constant 0 : index
      %75 = vector.load %arg9[%c0_45, %c0_46] : memref<256x1xf32, #tpu.memory_space<vmem>>, vector<256x1xf32>
      tpu.vector_store %arg9[%c0_45, %c0_46], %74 {strides = array<i32>} : memref<256x1xf32, #tpu.memory_space<vmem>>, vector<256x1xf32>,
    } else {
    }
    %c0 = arith.constant 0 : index
    %c0_1 = arith.constant 0 : index
    %c0_2 = arith.constant 0 : index
    %3 = vector.load %arg2[%c0, %c0_1, %c0_2] : memref<1x128x128xf32, #tpu.memory_space<vmem>>, vector<1x128x128xf32>
    %4 = vector.shape_cast %3 : vector<1x128x128xf32> to vector<128x128xf32>
    %5 = arith.truncf %4 : vector<128x128xf32> to vector<128x128xbf16>
    %c0_3 = arith.constant 0 : index
    %c0_4 = arith.constant 0 : index
    %6 = vector.load %arg4[%c0_3, %c0_4] : memref<528x256xbf16, #tpu.memory_space<vmem>>, vector<256x128xbf16>
    %cst = arith.constant dense<0.000000e+00> : vector<256x128xf32>
    %7 = tpu.matmul %6, %5, %cst {dimension_numbers = #tpu.dot_dimension_numbers<[1], [0], [0], [1], [0, 0, 1, 1], [], []>} : vector<256x128xbf16>, vector<128x128xbf16>, vector<256x128xf32> -> vector<256x128xf32>
    %c0_5 = arith.constant 0 : index
    %c0_6 = arith.constant 0 : index
    %8 = vector.load %arg9[%c0_5, %c0_6] : memref<256x1xf32, #tpu.memory_space<vmem>>, vector<256x1xf32>
    %9 = vector.broadcast %8 : vector<256x1xf32> to vector<256x128xf32>
    %10 = arith.addf %7, %9 : vector<256x128xf32>
    %cst_7 = arith.constant 0.000000e+00 : f32
    %11 = vector.broadcast %cst_7 : f32 to vector<256x128xf32>
    %12 = arith.maximumf %10, %11 : vector<256x128xf32>
    %c256 = arith.constant 256 : index
    %c0_8 = arith.constant 0 : index
    %13 = vector.load %arg4[%c256, %c0_8] : memref<528x256xbf16, #tpu.memory_space<vmem>>, vector<128x256xbf16>
    %14 = arith.truncf %12 : vector<256x128xf32> to vector<256x128xbf16>
    %cst_9 = arith.constant dense<0.000000e+00> : vector<128x128xf32>
    %15 = tpu.matmul %13, %14, %cst_9 {dimension_numbers = #tpu.dot_dimension_numbers<[1], [0], [0], [1], [0, 0, 1, 1], [], []>} : vector<128x256xbf16>, vector<256x128xbf16>, vector<128x128xf32> -> vector<128x128xf32>
    %c256_10 = arith.constant 256 : index
    %c0_11 = arith.constant 0 : index
    %16 = vector.load %arg6[%c256_10, %c0_11] : memref<528x1xf32, #tpu.memory_space<vmem>>, vector<128x1xf32>
    %17 = vector.broadcast %16 : vector<128x1xf32> to vector<128x128xf32>
    %18 = arith.addf %15, %17 : vector<128x128xf32>
    %cst_12 = arith.constant 0.000000e+00 : f32
    %19 = vector.broadcast %cst_12 : f32 to vector<128x128xf32>
    %20 = arith.maximumf %18, %19 : vector<128x128xf32>
    %c384 = arith.constant 384 : index
    %c0_13 = arith.constant 0 : index
    %21 = vector.load %arg4[%c384, %c0_13] : memref<528x256xbf16, #tpu.memory_space<vmem>>, vector<64x128xbf16>
    %22 = arith.truncf %20 : vector<128x128xf32> to vector<128x128xbf16>
    %cst_14 = arith.constant dense<0.000000e+00> : vector<64x128xf32>
    %23 = tpu.matmul %21, %22, %cst_14 {dimension_numbers = #tpu.dot_dimension_numbers<[1], [0], [0], [1], [0, 0, 1, 1], [], []>} : vector<64x128xbf16>, vector<128x128xbf16>, vector<64x128xf32> -> vector<64x128xf32>
    %c384_15 = arith.constant 384 : index
    %c0_16 = arith.constant 0 : index
    %24 = vector.load %arg6[%c384_15, %c0_16] : memref<528x1xf32, #tpu.memory_space<vmem>>, vector<64x1xf32>
    %25 = vector.broadcast %24 : vector<64x1xf32> to vector<64x128xf32>
    %26 = arith.addf %23, %25 : vector<64x128xf32>
    %cst_17 = arith.constant 0.000000e+00 : f32
    %27 = vector.broadcast %cst_17 : f32 to vector<64x128xf32>
    %28 = arith.maximumf %26, %27 : vector<64x128xf32>
    %c448 = arith.constant 448 : index
    %c0_18 = arith.constant 0 : index
    %29 = vector.load %arg4[%c448, %c0_18] : memref<528x256xbf16, #tpu.memory_space<vmem>>, vector<64x64xbf16>
    %30 = arith.truncf %28 : vector<64x128xf32> to vector<64x128xbf16>
    %cst_19 = arith.constant dense<0.000000e+00> : vector<64x128xf32>
    %31 = tpu.matmul %29, %30, %cst_19 {dimension_numbers = #tpu.dot_dimension_numbers<[1], [0], [0], [1], [0, 0, 1, 1], [], []>} : vector<64x64xbf16>, vector<64x128xbf16>, vector<64x128xf32> -> vector<64x128xf32>
    %c448_20 = arith.constant 448 : index
    %c0_21 = arith.constant 0 : index
    %32 = vector.load %arg6[%c448_20, %c0_21] : memref<528x1xf32, #tpu.memory_space<vmem>>, vector<64x1xf32>
    %33 = vector.broadcast %32 : vector<64x1xf32> to vector<64x128xf32>
    %34 = arith.addf %31, %33 : vector<64x128xf32>
    %cst_22 = arith.constant 0.000000e+00 : f32
    %35 = vector.broadcast %cst_22 : f32 to vector<64x128xf32>
    %36 = arith.maximumf %34, %35 : vector<64x128xf32>
    %c512 = arith.constant 512 : index
    %c0_23 = arith.constant 0 : index
    %37 = vector.load %arg4[%c512, %c0_23] : memref<528x256xbf16, #tpu.memory_space<vmem>>, vector<16x64xbf16>
    %38 = arith.truncf %36 : vector<64x128xf32> to vector<64x128xbf16>
    %cst_24 = arith.constant dense<0.000000e+00> : vector<16x128xf32>
    %39 = tpu.matmul %37, %38, %cst_24 {dimension_numbers = #tpu.dot_dimension_numbers<[1], [0], [0], [1], [0, 0, 1, 1], [], []>} : vector<16x64xbf16>, vector<64x128xbf16>, vector<16x128xf32> -> vector<16x128xf32>
    %c512_25 = arith.constant 512 : index
    %c0_26 = arith.constant 0 : index
    %40 = vector.load %arg6[%c512_25, %c0_26] : memref<528x1xf32, #tpu.memory_space<vmem>>, vector<16x1xf32>
    %41 = vector.broadcast %40 : vector<16x1xf32> to vector<16x128xf32>
    %42 = arith.addf %39, %41 : vector<16x128xf32>
    %cst_27 = arith.constant dense<0xFF800000> : vector<128xf32>
    %43 = vector.multi_reduction <maximumf>, %42, %cst_27 [0] : vector<16x128xf32> to vector<128xf32>
    %44 = vector.shape_cast %43 : vector<128xf32> to vector<1x128xf32>
    %45 = vector.broadcast %44 : vector<1x128xf32> to vector<16x128xf32>
    %46 = arith.subf %42, %45 : vector<16x128xf32>
    %47 = math.exp %46 : vector<16x128xf32>
    %cst_28 = arith.constant dense<0.000000e+00> : vector<128xf32>
    %48 = vector.multi_reduction <add>, %47, %cst_28 [0] : vector<16x128xf32> to vector<128xf32>
    %49 = vector.shape_cast %48 : vector<128xf32> to vector<1x128xf32>
    %50 = math.log %49 : vector<1x128xf32>
    %51 = vector.extract_strided_slice %46 {offsets = [0, 0], sizes = [10, 128], strides = [1, 1]} : vector<16x128xf32> to vector<10x128xf32>
    %52 = vector.broadcast %50 : vector<1x128xf32> to vector<10x128xf32>
    %53 = arith.subf %51, %52 : vector<10x128xf32>
    %c0_29 = arith.constant 0 : index
    %c0_30 = arith.constant 0 : index
    %c0_31 = arith.constant 0 : index
    %54 = vector.load %arg7[%c0_29, %c0_30, %c0_31] : memref<1x10x128xf32, #tpu.memory_space<vmem>>, vector<1x10x128xf32>
    %55 = vector.shape_cast %54 : vector<1x10x128xf32> to vector<10x128xf32>
    %56 = vector.shape_cast %53 : vector<10x128xf32> to vector<1x10x128xf32>
    tpu.vector_store %arg7[%c0_29, %c0_30, %c0_31], %56 {strides = array<i32>} : memref<1x10x128xf32, #tpu.memory_space<vmem>>, vector<1x10x128xf32>,
    %c0_i32_32 = arith.constant 0 : i32
    %57 = arith.cmpi eq, %arg1, %c0_i32_32 : i32
    %58 = arith.extui %57 : i1 to i32
    %c0_i32_33 = arith.constant 0 : i32
    %59 = arith.cmpi ne, %58, %c0_i32_33 : i32
    scf.if %59 {
      %c0_37 = arith.constant 0 : index
      %c0_38 = arith.constant 0 : index
      %66 = vector.load %arg10[%c0_37, %c0_38] : memref<64x128xf32, #tpu.memory_space<vmem>>, vector<64x128xf32>
      tpu.vector_store %arg10[%c0_37, %c0_38], %36 {strides = array<i32>} : memref<64x128xf32, #tpu.memory_space<vmem>>, vector<64x128xf32>,
    } else {
    }
    %c0_i32_34 = arith.constant 0 : i32
    %60 = arith.cmpi ne, %arg1, %c0_i32_34 : i32
    %61 = arith.extui %60 : i1 to i32
    %c0_i32_35 = arith.constant 0 : i32
    %62 = arith.cmpi ne, %61, %c0_i32_35 : i32
    scf.if %62 {
      %c0_37 = arith.constant 0 : index
      %c0_38 = arith.constant 0 : index
      %66 = vector.load %arg10[%c0_37, %c0_38] : memref<64x128xf32, #tpu.memory_space<vmem>>, vector<64x128xf32>
      %67 = arith.maximumf %66, %36 : vector<64x128xf32>
      %c0_39 = arith.constant 0 : index
      %c0_40 = arith.constant 0 : index
      %68 = vector.load %arg10[%c0_39, %c0_40] : memref<64x128xf32, #tpu.memory_space<vmem>>, vector<64x128xf32>
      tpu.vector_store %arg10[%c0_39, %c0_40], %67 {strides = array<i32>} : memref<64x128xf32, #tpu.memory_space<vmem>>, vector<64x128xf32>,
    } else {
    }
    %c2_i32 = arith.constant 2 : i32
    %63 = arith.cmpi eq, %arg1, %c2_i32 : i32
    %64 = arith.extui %63 : i1 to i32
    %c0_i32_36 = arith.constant 0 : i32
    %65 = arith.cmpi ne, %64, %c0_i32_36 : i32
    scf.if %65 {
      %c0_37 = arith.constant 0 : index
      %c0_38 = arith.constant 0 : index
      %66 = vector.load %arg10[%c0_37, %c0_38] : memref<64x128xf32, #tpu.memory_space<vmem>>, vector<64x128xf32>
      %cst_39 = arith.constant dense<0xFF800000> : vector<64xf32>
      %67 = vector.multi_reduction <maximumf>, %66, %cst_39 [1] : vector<64x128xf32> to vector<64xf32>
      %68 = vector.shape_cast %67 : vector<64xf32> to vector<64x1xf32>
      %c0_40 = arith.constant 0 : index
      %c0_41 = arith.constant 0 : index
      %c0_42 = arith.constant 0 : index
      %69 = vector.load %arg8[%c0_40, %c0_41, %c0_42] : memref<1x64x1xf32, #tpu.memory_space<vmem>>, vector<1x64x1xf32>
      %70 = vector.shape_cast %69 : vector<1x64x1xf32> to vector<64x1xf32>
      %71 = vector.shape_cast %68 : vector<64x1xf32> to vector<1x64x1xf32>
      tpu.vector_store %arg8[%c0_40, %c0_41, %c0_42], %71 {strides = array<i32>} : memref<1x64x1xf32, #tpu.memory_space<vmem>>, vector<1x64x1xf32>,
    } else {
    }
    return
  }
  func.func @transform_0(%arg0: i32, %arg1: i32) -> (i32, i32, i32) {
    %c0_i32 = arith.constant 0 : i32
    %c0_i32_0 = arith.constant 0 : i32
    return %arg0, %c0_i32, %arg1 : i32, i32, i32
  }
  func.func @transform_1(%arg0: i32, %arg1: i32) -> (i32, i32, i32) {
    %c0_i32 = arith.constant 0 : i32
    %c0_i32_0 = arith.constant 0 : i32
    %c0_i32_1 = arith.constant 0 : i32
    return %arg0, %c0_i32, %c0_i32_0 : i32, i32, i32
  }
  func.func @transform_2(%arg0: i32, %arg1: i32) -> (i32, i32) {
    %c0_i32 = arith.constant 0 : i32
    %c0_i32_0 = arith.constant 0 : i32
    %c0_i32_1 = arith.constant 0 : i32
    return %c0_i32, %c0_i32_0 : i32, i32
  }
  func.func @transform_3(%arg0: i32, %arg1: i32) -> (i32, i32) {
    %c0_i32 = arith.constant 0 : i32
    %c0_i32_0 = arith.constant 0 : i32
    %c0_i32_1 = arith.constant 0 : i32
    return %c0_i32, %c0_i32_0 : i32, i32
  }
  func.func @transform_4(%arg0: i32, %arg1: i32) -> (i32, i32) {
    %c0_i32 = arith.constant 0 : i32
    %c0_i32_0 = arith.constant 0 : i32
    %c0_i32_1 = arith.constant 0 : i32
    return %c0_i32, %c0_i32_0 : i32, i32
  }
  func.func @transform_5(%arg0: i32, %arg1: i32) -> (i32, i32, i32) {
    %c0_i32 = arith.constant 0 : i32
    %c0_i32_0 = arith.constant 0 : i32
    return %arg0, %c0_i32, %arg1 : i32, i32, i32
  }
  func.func @transform_6(%arg0: i32, %arg1: i32) -> (i32, i32, i32) {
    %c0_i32 = arith.constant 0 : i32
    %c0_i32_0 = arith.constant 0 : i32
    %c0_i32_1 = arith.constant 0 : i32
    return %arg0, %c0_i32, %c0_i32_0 : i32, i32, i32
  }
}

</mosaic_0001>

<bundles_post_ra>
// kernel: point_prediction_forward.1
= control target key start
LH: loop header
LB: loop body
LE: loop exit
PB: predicated region body
PF: predicated region fallthrough
CT: control target
= control target key end

     0   :  { %12 = vsyncpa [#allocation6], 0  ;;  %s2739_s21 = smov 0   ;;  %s2741_s22 = smov 0   ;;  %s3463_s0 = inlined_call_operand.vmem [shape: f32[2,128,384], index: 0, kind: input, shape index: {}]   ;;  %s3464_s1 = inlined_call_operand.vmem [shape: f32[2,1,96], index: 1, kind: input, shape index: {}]   ;;  %s3465_s2 = inlined_call_operand.hbm [shape: bf16[528,256], index: 2, kind: input, shape index: {}]   ;;  %s3466_s3 = inlined_call_operand.vmem [shape: f32[256,96], index: 3, kind: input, shape index: {}]   ;;  %s3467_s4 = inlined_call_operand.vmem [shape: f32[528,1], index: 4, kind: input, shape index: {}]   ;;  %s3468_s5 = inlined_call_operand.vmem [shape: f32[2,10,384], index: 5, kind: output, shape index: {0}]   ;;  %s3469_s6 = inlined_call_operand.vmem [shape: f32[2,64,1], index: 6, kind: output, shape index: {1}]  }
   0x1   :  { %s2743_s23 = smov 0   ;;  %s2745_s24 = smov 0  }
   0x2   :  { %s2747_s25 = smov 0   ;;  %s2749_s26 = smov 0  }
   0x3   :  { %s2751_s27 = smov 0  }
   0x4 LB: > { %s2197_s28 = sadd.s32 4294967295, %s2696_s27   ;;  %s27_s29 = sadd.s32 1, %s2688_s25  ;;  %s2696_s27 = sphi %s2751_s27, %s18_s27   ;;  %s2692_s26 = sphi %s2749_s26, %s3495_s26   ;;  %s2688_s25 = sphi %s2747_s25, %s3494_s25   ;;  %s2684_s24 = sphi %s2745_s24, %s3493_s24   ;;  %s2680_s23 = sphi %s2743_s23, %s3492_s23   ;;  %s2676_s22 = sphi %s2741_s22, %s3491_s22   ;;  %s2672_s21 = sphi %s2739_s21, %s3490_s21  }
   0x5   : > { %p28_p0 = scmp.ge.s32.totalorder %s27_s29, 3  ;;  %s30_s30 = sadd.s32 1, %s2692_s26 }
   0x6   : > { %s39_s7 = sadd.s32 1, %s2676_s22  ;;  %p46_p1 = scmp.ne.s32.totalorder %s2676_s22, %s2672_s21 }
   0x7   : > { %s3497_s29 = smov (%p28_p0, %s27_s29), 0  ;;  %s3499_s30 = smov (!%p28_p0, %s30_s30), %s2692_s26 }
   0x8   : > { %3475 = sst [smem:[#allocation9_spill]] %s3497_s29  ;;  %s35_s8 = ssub.s32 %s2688_s25, %s3497_s29 }
   0x9   : > { %p47_p2 = scmp.eq.s32.totalorder %s2696_s27, 0  ;;  %p32_p3 = scmp.ge.s32.totalorder %s3499_s30, 2 }
   0xa   : > { %p167_p4 = scmp.eq.s32.totalorder %s2197_s28, 5  ;;  %p2199_p6 = scmp.ge.s32.totalorder %s2696_s27, 1 }
   0xb   : > { %p2786_p5 = por %p47_p2, %p46_p1  ;;  %s3501_s30 = smov (%p32_p3, %s3499_s30), 0 }
   0xc   : > { %3477 = sst [smem:[#allocation10_spill]] %s3501_s30  ;;  %p2793_p7 = por %p167_p4, %p46_p1 }
   0xd   : > { %s3476_s9 = scalar_select %p2786_p5, 1, 0 }
   0xe   : > { %s3478_s10 = scalar_select %p2793_p7, 1, 0 }
   0xf   : > { %p206_p8 = scmp.lt.s32.totalorder %s2696_s27, 7  ;;  %s34_s11 = ssub.s32 %s2692_s26, %s3501_s30 }
  0x10   : > { %s36_s12 = sor.u32 %s35_s8, %s34_s11  ;;  %p2804_p11 = scmp.eq.s32.totalorder %s2197_s28, 0 }
  0x11   : > { %p2800_p9 = pnand %p2199_p6, %p206_p8  ;;  %p37_p10 = scmp.eq.s32.totalorder %s36_s12, 0 }
  0x12   : > { %s3480_s14 = scalar_select %p2804_p11, 1, 0 }
  0x13   : > { %s3479_s13 = scalar_select %p2800_p9, 1, 0 }
  0x14   : > { %p2485_p12 = pneg %p2800_p9  ;;  %s2698_s16 = smov [#allocation5]  }
  0x15   : > { %s2811_s15 = scalar_select %p37_p10, %s2676_s22, %s39_s7  }
  0x16   : > { %s218_s17 = sshll.u32 %s2698_s16, 4  ;;  %p2815_p13 = pnand %p2804_p11, %p2485_p12  ;;  %s219_s17 = int_to_ptr.vmem [resolvable:$true] %s218_s17 }
  0x17   : > { %3481 = sst [smem:[#allocation11_spill]] %s2811_s15  ;;  %s2610_s28 = scalar_lea.hbm %s3465_s2, 8448 }
  0x18   : > { %p2611_p0 = scmp.ne.s32.totalorder %s3465_s2, %s2610_s28  ;;  %p2612_p1 = pneg %p2815_p13 }
  0x19   : > { %p2617_p4 = scmp.lt.u32.totalorder %s2610_s28, %s3465_s2 }
  0x1a   : > { %p2613_p2 = pnand %p2612_p1, %p2611_p0 }
  0x1c   : > { %p2614_p3 = pneg %p2613_p2 }
  0x1e   : > { %p2619_p6 = pnand %p2617_p4, %p2614_p3 }
  0x20   : > { %2622 = shalt.err (!%p2619_p6)
}
  0x21   : > { %s2623_s16 = scalar_lea.vmem %s219_s17, 8448  ;;  %p2631_p7 = scmp.lt.s32.totalorder %s219_s17, %s219_s17 }
  0x22   : > { %p2624_p8 = scmp.ne.s32.totalorder %s219_s17, %s2623_s16  ;;  %p2632_p11 = scmp.lt.s32.totalorder %s2623_s16, %s2623_s16 }
  0x24   : > { %p2626_p10 = pnand %p2624_p8, %p2612_p1  ;;  %p2633_p9 = por %p2632_p11, %p2631_p7 }
  0x26   : > { %p2627_p12 = pneg %p2626_p10 }
  0x28   : > { %p2634_p5 = pnand %p2633_p9, %p2627_p12 }
  0x2a   : > { %2637 = shalt.err (!%p2634_p5)
}
  0x2b   : > { %s2699_s19 = smov 128   ;;  %s2700_s20 = smov 8  }
  0x2c   : > { %2488 = dma.hbm_to_vmem [thread:$0]  (!%p2815_p13), %s3465_s2, 8448, %s219_s17, [#allocation6], %s2699_s19, %s2699_s19, %s2700_s20  }
  0x2d   : > { %p2201_p0 = scmp.ge.s32.totalorder %s2696_s27, 6 }
  0x2e   : > { %p3483_p2 = scmp.ne.s32.totalorder (!%p2201_p0), %s3476_s9, 0 }
  0x2f   : > { %234 = sbr.rel (%p2201_p0) target bundleno = 69 (0x45), region = 28 }
  0x36   : > { %237 = sbr.rel (!%p3483_p2) target bundleno = 69 (0x45), region = 32  ;;  %s239_s28 = sand.u32 (%p3483_p2), 1, %s2676_s22  }
  0x37   : > { %s2479_s7 = smul.u32 (%p3483_p2), 48, %s2692_s26  ;;  %s2202_s12 = sshll.u32 (%p3483_p2), %s239_s28, 7 }
  0x38   : > { %s241_s9 = scalar_lea.vmem (%p3483_p2), [#allocation4], %s2202_s12 }
  0x39   : > { %s243_s16 = sadd.s32 (%p3483_p2), %s2688_s25, %s2479_s7 }
  0x3a   : > { %s2203_s30 = sshll.u32 (%p3483_p2), %s243_s16, 3 }
  0x3b   : > { %s2844_s15 = scalar_lea.vmem (%p3483_p2), %s3463_s0, %s2203_s30 }
  0x3c   : > { %v303_v0 = vld [vmem:[%s2844_s15] sm:$0xff] (%p3483_p2)  ;;  %v305_v1 = vld [vmem:[%s2844_s15 + $0x18] sm:$0xff] (%p3483_p2)  ;;  %v307_v2 = vld [vmem:[%s2844_s15 + $0x30] sm:$0xff] (%p3483_p2) }
  0x3d   : > { %304 = vst [vmem:[%s241_s9] sm:$0xff] %v303_v0  ;;  %306 = vst [vmem:[%s241_s9 + $0x8] sm:$0xff] %v305_v1  ;;  %v309_v3 = vld [vmem:[%s2844_s15 + $0x48] sm:$0xff]  ;;  %v311_v4 = vld [vmem:[%s2844_s15 + $0x60] sm:$0xff] }
  0x3e   : > { %308 = vst [vmem:[%s241_s9 + $0x10] sm:$0xff] %v307_v2  ;;  %v313_v5 = vld [vmem:[%s2844_s15 + $0x78] sm:$0xff]  ;;  %310 = vst [vmem:[%s241_s9 + $0x18] sm:$0xff] %v309_v3  ;;  %v315_v6 = vld [vmem:[%s2844_s15 + $0x90] sm:$0xff] }
  0x3f   : > { %312 = vst [vmem:[%s241_s9 + $0x20] sm:$0xff] %v311_v4  ;;  %314 = vst [vmem:[%s241_s9 + $0x28] sm:$0xff] %v313_v5  ;;  %v317_v7 = vld [vmem:[%s2844_s15 + $0xa8] sm:$0xff]  ;;  %v319_v8 = vld [vmem:[%s2844_s15 + $0xc0] sm:$0xff] }
  0x40   : > { %316 = vst [vmem:[%s241_s9 + $0x30] sm:$0xff] %v315_v6  ;;  %318 = vst [vmem:[%s241_s9 + $0x38] sm:$0xff] %v317_v7  ;;  %v321_v9 = vld [vmem:[%s2844_s15 + $0xd8] sm:$0xff]  ;;  %v323_v10 = vld [vmem:[%s2844_s15 + $0xf0] sm:$0xff] }
  0x41   : > { %320 = vst [vmem:[%s241_s9 + $0x40] sm:$0xff] %v319_v8  ;;  %v325_v11 = vld [vmem:[%s2844_s15 + $0x108] sm:$0xff]  ;;  %322 = vst [vmem:[%s241_s9 + $0x48] sm:$0xff] %v321_v9  ;;  %v327_v12 = vld [vmem:[%s2844_s15 + $0x120] sm:$0xff] }
  0x42   : > { %324 = vst [vmem:[%s241_s9 + $0x50] sm:$0xff] %v323_v10  ;;  %326 = vst [vmem:[%s241_s9 + $0x58] sm:$0xff] %v325_v11  ;;  %v329_v13 = vld [vmem:[%s2844_s15 + $0x138] sm:$0xff]  ;;  %v331_v14 = vld [vmem:[%s2844_s15 + $0x150] sm:$0xff] }
  0x43   : > { %328 = vst [vmem:[%s241_s9 + $0x60] sm:$0xff] %v327_v12  ;;  %330 = vst [vmem:[%s241_s9 + $0x68] sm:$0xff] %v329_v13  ;;  %v333_v15 = vld [vmem:[%s2844_s15 + $0x168] sm:$0xff] }
  0x44   : > { %332 = vst [vmem:[%s241_s9 + $0x70] sm:$0xff] %v331_v14  ;;  %334 = vst [vmem:[%s241_s9 + $0x78] sm:$0xff] %v333_v15 }
  0x45 PF: > { %p3484_p5 = scmp.ne.s32.totalorder %s3479_s13, 0 }
  0x46   : > { %s352_s29 = sand.u32 (!%p3484_p5), 1, %s2672_s21   ;;  %p3485_p7 = scmp.ne.s32.totalorder (!%p3484_p5), %s3480_s14, 0 }
  0x47   : > { %349 = sbr.rel (%p3484_p5) target bundleno = 1824 (0x720), region = 74  ;;  %s2205_s30 = sshll.u32 (!%p3484_p5), %s352_s29, 7 }
  0x48   : > { %s2865_s17 = scalar_lea.vmem (!%p3484_p5), [#allocation4], %s2205_s30 }
  0x4e   : > { %2667 = dma.done.wait (%p3485_p7), [#allocation6], 8448  }
  0x4f   : > { %2669 = vsyncadd (%p3485_p7), [#allocation6], 4294958848  ;;  %s2207_s15 = sshll.u32 %s352_s29, 4  ;;  %p392_p9 = scmp.lt.s32.totalorder %s2684_s24, 1 }
  0x50   : > { %s2881_s12 = scalar_lea.vmem [#allocation7], %s2207_s15  ;;  %p2210_p11 = scmp.ne.s32.totalorder %s2680_s23, 0 }
  0x51   : > { %s393_s19 = scalar_select %p392_p9, %s2684_s24, 1 }
  0x52   : > { %404 = sbr.rel (%p2210_p11) target bundleno = 293 (0x125), region = 86  ;;  %v408_v17 = vld [vmem:[%s3466_s3 + $0x10] sm:$0xff] (!%p2210_p11)  ;;  %vm476_vm0 = vcmask (!%p2210_p11), 785408   ;;  %v406_v18 = vld [vmem:[%s3466_s3] sm:$0xff] (!%p2210_p11)  ;;  %v409_v21 = vld [vmem:[%s3466_s3 + $0x18] sm:$0xff] (!%p2210_p11)  ;;  %vm637_vm1 = vcmask (!%p2210_p11), 7168  }
  0x53   : > { %s394_s13 = scalar_lea.vmem %s3464_s1, %s393_s19  ;;  %s2265_s11 = sshll.u32 %s393_s19, 6  ;;  %v407_v22 = vld [vmem:[%s3466_s3 + $0x8] sm:$0xff] (!%p2210_p11)  ;;  %v410_v26 = vld [vmem:[%s3466_s3 + $0x20] sm:$0xff] (!%p2210_p11)  ;;  %v413_v33 = vld [vmem:[%s3466_s3 + $0x38] sm:$0xff] (!%p2210_p11) }
  0x54   : > { %s2879_s7 = scalar_lea.vmem %s3469_s6, %s2265_s11  ;;  %v2886_v16 = vld [vmem:[%s394_s13] ss:$0 sm:$0xff] (!%p2210_p11)  ;;  %v411_v25 = vld [vmem:[%s3466_s3 + $0x28] sm:$0xff] (!%p2210_p11)  ;;  %v412_v34 = vld [vmem:[%s3466_s3 + $0x30] sm:$0xff] (!%p2210_p11) }
  0x55   : > { %v446_v19 = vmul.f32 (!%p2210_p11), %v2886_v16, %v408_v17  ;;  %v444_v20 = vmul.f32 (!%p2210_p11), %v2886_v16, %v406_v18  ;;  %v447_v23 = vmul.f32 (!%p2210_p11), %v2886_v16, %v409_v21  ;;  %v445_v24 = vmul.f32 (!%p2210_p11), %v2886_v16, %v407_v22  ;;  %v415_v39 = vld [vmem:[%s3466_s3 + $0x48] sm:$0xff] (!%p2210_p11)  ;;  %v414_v40 = vld [vmem:[%s3466_s3 + $0x40] sm:$0xff] (!%p2210_p11)  ;;  %v417_v45 = vld [vmem:[%s3466_s3 + $0x58] sm:$0xff] (!%p2210_p11) }
  0x56   : > { %v449_v31 = vmul.f32 (!%p2210_p11), %v2886_v16, %v411_v25  ;;  %v448_v32 = vmul.f32 (!%p2210_p11), %v2886_v16, %v410_v26  ;;  %v451_v37 = vmul.f32 (!%p2210_p11), %v2886_v16, %v413_v33  ;;  %v450_v38 = vmul.f32 (!%p2210_p11), %v2886_v16, %v412_v34  ;;  %v416_v46 = vld [vmem:[%s3466_s3 + $0x50] sm:$0xff] (!%p2210_p11)  ;;  %v419_v51 = vld [vmem:[%s3466_s3 + $0x68] sm:$0xff] (!%p2210_p11)  ;;  %v418_v52 = vld [vmem:[%s3466_s3 + $0x60] sm:$0xff] (!%p2210_p11) }
  0x57   : > { %v483_v27 = vsel (!%p2210_p11), %vm476_vm0, %v446_v19, 0.0  ;;  %v477_v28 = vsel (!%p2210_p11), %vm476_vm0, %v444_v20, 0.0  ;;  %v486_v29 = vsel (!%p2210_p11), %vm476_vm0, %v447_v23, 0.0  ;;  %v480_v30 = vsel (!%p2210_p11), %vm476_vm0, %v445_v24, 0.0  ;;  %v421_v57 = vld [vmem:[%s3466_s3 + $0x78] sm:$0xff] (!%p2210_p11)  ;;  %v420_v58 = vld [vmem:[%s3466_s3 + $0x70] sm:$0xff] (!%p2210_p11) }
  0x58   : > { %484 = vadd.xlane.f32.xlu1 (!%p2210_p11), %v483_v27  ;;  %478 = vadd.xlane.f32.xlu0 (!%p2210_p11), %v477_v28  ;;  %v492_v35 = vsel (!%p2210_p11), %vm476_vm0, %v449_v31, 0.0  ;;  %v489_v36 = vsel (!%p2210_p11), %vm476_vm0, %v448_v32, 0.0  ;;  %v498_v41 = vsel (!%p2210_p11), %vm476_vm0, %v451_v37, 0.0  ;;  %v495_v42 = vsel (!%p2210_p11), %vm476_vm0, %v450_v38, 0.0  ;;  %v423_v63 = vld [vmem:[%s3466_s3 + $0x88] sm:$0xff] (!%p2210_p11)  ;;  %v422_v0 = vld [vmem:[%s3466_s3 + $0x80] sm:$0xff] (!%p2210_p11) }
  0x59   : > { %v453_v43 = vmul.f32 %v2886_v16, %v415_v39  ;;  %v452_v44 = vmul.f32 %v2886_v16, %v414_v40  ;;  %v455_v49 = vmul.f32 %v2886_v16, %v417_v45  ;;  %v454_v50 = vmul.f32 %v2886_v16, %v416_v46  ;;  %v425_v5 = vld [vmem:[%s3466_s3 + $0x98] sm:$0xff]  ;;  %v424_v6 = vld [vmem:[%s3466_s3 + $0x90] sm:$0xff]  ;;  %v427_v11 = vld [vmem:[%s3466_s3 + $0xa8] sm:$0xff] }
  0x5a   : > { %v457_v55 = vmul.f32 %v2886_v16, %v419_v51  ;;  %v456_v56 = vmul.f32 %v2886_v16, %v418_v52  ;;  %v459_v61 = vmul.f32 %v2886_v16, %v421_v57  ;;  %v458_v62 = vmul.f32 %v2886_v16, %v420_v58  ;;  %v426_v12 = vld [vmem:[%s3466_s3 + $0xa0] sm:$0xff]  ;;  %v429_v18 = vld [vmem:[%s3466_s3 + $0xb8] sm:$0xff]  ;;  %v428_v19 = vld [vmem:[%s3466_s3 + $0xb0] sm:$0xff] }
  0x5b   : > { %v504_v47 = vsel %vm476_vm0, %v453_v43, 0.0  ;;  %v501_v48 = vsel %vm476_vm0, %v452_v44, 0.0  ;;  %v510_v53 = vsel %vm476_vm0, %v455_v49, 0.0  ;;  %v507_v54 = vsel %vm476_vm0, %v454_v50, 0.0  ;;  %v431_v24 = vld [vmem:[%s3466_s3 + $0xc8] sm:$0xff]  ;;  %v430_v25 = vld [vmem:[%s3466_s3 + $0xc0] sm:$0xff] }
  0x5c   : > { %487 = vadd.xlane.f32.xlu1 %v486_v29  ;;  %481 = vadd.xlane.f32.xlu0 %v480_v30  ;;  %v516_v59 = vsel %vm476_vm0, %v457_v55, 0.0  ;;  %v513_v60 = vsel %vm476_vm0, %v456_v56, 0.0  ;;  %v522_v1 = vsel %vm476_vm0, %v459_v61, 0.0  ;;  %v519_v2 = vsel %vm476_vm0, %v458_v62, 0.0  ;;  %v433_v30 = vld [vmem:[%s3466_s3 + $0xd8] sm:$0xff]  ;;  %v432_v31 = vld [vmem:[%s3466_s3 + $0xd0] sm:$0xff] }
  0x5d   : > { %v461_v3 = vmul.f32 %v2886_v16, %v423_v63  ;;  %v460_v4 = vmul.f32 %v2886_v16, %v422_v0  ;;  %v463_v9 = vmul.f32 %v2886_v16, %v425_v5  ;;  %v462_v10 = vmul.f32 %v2886_v16, %v424_v6  ;;  %v434_v37 = vld [vmem:[%s3466_s3 + $0xe0] sm:$0xff]  ;;  %v436_v43 = vld [vmem:[%s3466_s3 + $0xf0] sm:$0xff]  ;;  %v576_v55 = vld [vmem:[%s3467_s4 + $0x18] sm:$0xff] }
  0x5e   : > { %v465_v15 = vmul.f32 %v2886_v16, %v427_v11  ;;  %v464_v17 = vmul.f32 %v2886_v16, %v426_v12  ;;  %v467_v22 = vmul.f32 %v2886_v16, %v429_v18  ;;  %v466_v23 = vmul.f32 %v2886_v16, %v428_v19  ;;  %v575_v50 = vld [vmem:[%s3467_s4 + $0x10] sm:$0xff]  ;;  %v573_v51 = vld [vmem:[%s3467_s4] sm:$0xff]  ;;  %v574_v56 = vld [vmem:[%s3467_s4 + $0x8] sm:$0xff] }
  0x5f   : > { %v528_v7 = vsel %vm476_vm0, %v461_v3, 0.0  ;;  %v525_v8 = vsel %vm476_vm0, %v460_v4, 0.0  ;;  %v534_v13 = vsel %vm476_vm0, %v463_v9, 0.0  ;;  %v531_v14 = vsel %vm476_vm0, %v462_v10, 0.0  ;;  %v578_v61 = vld [vmem:[%s3467_s4 + $0x28] sm:$0xff]  ;;  %v577_v62 = vld [vmem:[%s3467_s4 + $0x20] sm:$0xff] }
  0x60   : > { %493 = vadd.xlane.f32.xlu1 %v492_v35  ;;  %490 = vadd.xlane.f32.xlu0 %v489_v36  ;;  %v540_v20 = vsel %vm476_vm0, %v465_v15, 0.0  ;;  %v537_v21 = vsel %vm476_vm0, %v464_v17, 0.0  ;;  %v546_v26 = vsel %vm476_vm0, %v467_v22, 0.0  ;;  %v543_v27 = vsel %vm476_vm0, %v466_v23, 0.0  ;;  %v435_v36 = vld [vmem:[%s3466_s3 + $0xe8] sm:$0xff]  ;;  %v580_v3 = vld [vmem:[%s3467_s4 + $0x38] sm:$0xff] }
  0x61   : > { %v469_v28 = vmul.f32 %v2886_v16, %v431_v24  ;;  %v468_v29 = vmul.f32 %v2886_v16, %v430_v25  ;;  %v471_v34 = vmul.f32 %v2886_v16, %v433_v30  ;;  %v470_v35 = vmul.f32 %v2886_v16, %v432_v31  ;;  %v579_v4 = vld [vmem:[%s3467_s4 + $0x30] sm:$0xff]  ;;  %v582_v9 = vld [vmem:[%s3467_s4 + $0x48] sm:$0xff]  ;;  %v581_v10 = vld [vmem:[%s3467_s4 + $0x40] sm:$0xff] }
  0x62   : > { %v473_v40 = vmul.f32 %v2886_v16, %v435_v36  ;;  %v584_v15 = vld [vmem:[%s3467_s4 + $0x58] sm:$0xff]  ;;  %v583_v17 = vld [vmem:[%s3467_s4 + $0x50] sm:$0xff]  ;;  %v586_v22 = vld [vmem:[%s3467_s4 + $0x68] sm:$0xff] }
  0x63   : > { %v552_v32 = vsel %vm476_vm0, %v469_v28, 0.0  ;;  %v549_v33 = vsel %vm476_vm0, %v468_v29, 0.0  ;;  %v558_v38 = vsel %vm476_vm0, %v471_v34, 0.0  ;;  %v555_v39 = vsel %vm476_vm0, %v470_v35, 0.0  ;;  %v585_v23 = vld [vmem:[%s3467_s4 + $0x60] sm:$0xff]  ;;  %v588_v28 = vld [vmem:[%s3467_s4 + $0x78] sm:$0xff] }
  0x64   : > { %499 = vadd.xlane.f32.xlu1 %v498_v41  ;;  %496 = vadd.xlane.f32.xlu0 %v495_v42  ;;  %v472_v41 = vmul.f32 %v2886_v16, %v434_v37  ;;  %v437_v42 = vld [vmem:[%s3466_s3 + $0xf8] sm:$0xff]  ;;  %v564_v44 = vsel %vm476_vm0, %v473_v40, 0.0  ;;  %v587_v29 = vld [vmem:[%s3467_s4 + $0x70] sm:$0xff]  ;;  %v590_v34 = vld [vmem:[%s3467_s4 + $0x88] sm:$0xff] }
  0x65   : > { %v475_v46 = vmul.f32 %v2886_v16, %v437_v42  ;;  %v589_v35 = vld [vmem:[%s3467_s4 + $0x80] sm:$0xff]  ;;  %v592_v40 = vld [vmem:[%s3467_s4 + $0x98] sm:$0xff] }
  0x66   : > { %v561_v45 = vsel %vm476_vm0, %v472_v41, 0.0  ;;  %v591_v41 = vld [vmem:[%s3467_s4 + $0x90] sm:$0xff] }
  0x68   : > { %505 = vadd.xlane.f32.xlu1 %v504_v47  ;;  %502 = vadd.xlane.f32.xlu0 %v501_v48  ;;  %v474_v47 = vmul.f32 %v2886_v16, %v436_v43  ;;  %v570_v48 = vsel %vm476_vm0, %v475_v46, 0.0  ;;  %v594_v46 = vld [vmem:[%s3467_s4 + $0xa8] sm:$0xff] }
  0x6a   : > { %v567_v49 = vsel %vm476_vm0, %v474_v47, 0.0  ;;  %v593_v47 = vld [vmem:[%s3467_s4 + $0xa0] sm:$0xff] }
  0x6c   : > { %511 = vadd.xlane.f32.xlu1 %v510_v53  ;;  %508 = vadd.xlane.f32.xlu0 %v507_v54 }
  0x70   : > { %517 = vadd.xlane.f32.xlu1 %v516_v59  ;;  %514 = vadd.xlane.f32.xlu0 %v513_v60 }
  0x74   : > { %523 = vadd.xlane.f32.xlu1 %v522_v1  ;;  %520 = vadd.xlane.f32.xlu0 %v519_v2 }
  0x78   : > { %529 = vadd.xlane.f32.xlu1 %v528_v7  ;;  %526 = vadd.xlane.f32.xlu0 %v525_v8 }
  0x7c   : > { %535 = vadd.xlane.f32.xlu1 %v534_v13  ;;  %532 = vadd.xlane.f32.xlu0 %v531_v14 }
  0x80   : > { %541 = vadd.xlane.f32.xlu1 %v540_v20  ;;  %538 = vadd.xlane.f32.xlu0 %v537_v21 }
  0x84   : > { %547 = vadd.xlane.f32.xlu1 %v546_v26  ;;  %544 = vadd.xlane.f32.xlu0 %v543_v27 }
  0x88   : > { %553 = vadd.xlane.f32.xlu1 %v552_v32  ;;  %550 = vadd.xlane.f32.xlu0 %v549_v33 }
  0x8c   : > { %559 = vadd.xlane.f32.xlu1 %v558_v38  ;;  %556 = vadd.xlane.f32.xlu0 %v555_v39 }
  0x90   : > { %565 = vadd.xlane.f32.xlu1 %v564_v44  ;;  %562 = vadd.xlane.f32.xlu0 %v561_v45 }
  0x94   : > { %571 = vadd.xlane.f32.xlu1 %v570_v48  ;;  %568 = vadd.xlane.f32.xlu0 %v567_v49 }
  0xe5   : > { %v485_v52 = vpop.xlane.xlu1 %484  ;;  %v479_v53 = vpop.xlane.xlu0 %478 }
  0xe6   : > { %v607_v16 = vadd.f32 %v575_v50, %v485_v52  ;;  %v605_v54 = vadd.f32 %v573_v51, %v479_v53  ;;  %v596_v52 = vld [vmem:[%s3467_s4 + $0xb8] sm:$0xff]  ;;  %v595_v53 = vld [vmem:[%s3467_s4 + $0xb0] sm:$0xff] }
  0xe8   : > { %640 = vst.msk [vmem:[#allocation2 + $0x10] sm:$0xff] %vm637_vm1, %v607_v16  ;;  %638 = vst.msk [vmem:[#allocation2] sm:$0xff] %vm637_vm1, %v605_v54 }
  0xe9   : > { %v488_v57 = vpop.xlane.xlu1 %487  ;;  %v482_v58 = vpop.xlane.xlu0 %481 }
  0xea   : > { %v608_v59 = vadd.f32 %v576_v55, %v488_v57  ;;  %v606_v60 = vadd.f32 %v574_v56, %v482_v58  ;;  %v598_v57 = vld [vmem:[%s3467_s4 + $0xc8] sm:$0xff]  ;;  %v597_v58 = vld [vmem:[%s3467_s4 + $0xc0] sm:$0xff] }
  0xec   : > { %641 = vst.msk [vmem:[#allocation2 + $0x18] sm:$0xff] %vm637_vm1, %v608_v59  ;;  %639 = vst.msk [vmem:[#allocation2 + $0x8] sm:$0xff] %vm637_vm1, %v606_v60 }
  0xed   : > { %v494_v63 = vpop.xlane.xlu1 %493  ;;  %v491_v0 = vpop.xlane.xlu0 %490 }
  0xee   : > { %v610_v1 = vadd.f32 %v578_v61, %v494_v63  ;;  %v609_v2 = vadd.f32 %v577_v62, %v491_v0  ;;  %v600_v63 = vld [vmem:[%s3467_s4 + $0xd8] sm:$0xff]  ;;  %v599_v0 = vld [vmem:[%s3467_s4 + $0xd0] sm:$0xff] }
  0xf0   : > { %643 = vst.msk [vmem:[#allocation2 + $0x28] sm:$0xff] %vm637_vm1, %v610_v1  ;;  %642 = vst.msk [vmem:[#allocation2 + $0x20] sm:$0xff] %vm637_vm1, %v609_v2 }
  0xf1   : > { %v500_v5 = vpop.xlane.xlu1 %499  ;;  %v497_v6 = vpop.xlane.xlu0 %496 }
  0xf2   : > { %v612_v7 = vadd.f32 %v580_v3, %v500_v5  ;;  %v611_v8 = vadd.f32 %v579_v4, %v497_v6  ;;  %v602_v5 = vld [vmem:[%s3467_s4 + $0xe8] sm:$0xff]  ;;  %v601_v6 = vld [vmem:[%s3467_s4 + $0xe0] sm:$0xff] }
  0xf4   : > { %645 = vst.msk [vmem:[#allocation2 + $0x38] sm:$0xff] %vm637_vm1, %v612_v7  ;;  %644 = vst.msk [vmem:[#allocation2 + $0x30] sm:$0xff] %vm637_vm1, %v611_v8 }
  0xf5   : > { %v506_v11 = vpop.xlane.xlu1 %505  ;;  %v503_v12 = vpop.xlane.xlu0 %502 }
  0xf6   : > { %v614_v13 = vadd.f32 %v582_v9, %v506_v11  ;;  %v613_v14 = vadd.f32 %v581_v10, %v503_v12  ;;  %v604_v11 = vld [vmem:[%s3467_s4 + $0xf8] sm:$0xff]  ;;  %v603_v12 = vld [vmem:[%s3467_s4 + $0xf0] sm:$0xff] }
  0xf8   : > { %647 = vst.msk [vmem:[#allocation2 + $0x48] sm:$0xff] %vm637_vm1, %v614_v13  ;;  %646 = vst.msk [vmem:[#allocation2 + $0x40] sm:$0xff] %vm637_vm1, %v613_v14 }
  0xf9   : > { %v512_v18 = vpop.xlane.xlu1 %511  ;;  %v509_v19 = vpop.xlane.xlu0 %508 }
  0xfa   : > { %v616_v20 = vadd.f32 %v584_v15, %v512_v18  ;;  %v615_v21 = vadd.f32 %v583_v17, %v509_v19 }
  0xfc   : > { %649 = vst.msk [vmem:[#allocation2 + $0x58] sm:$0xff] %vm637_vm1, %v616_v20  ;;  %648 = vst.msk [vmem:[#allocation2 + $0x50] sm:$0xff] %vm637_vm1, %v615_v21 }
  0xfd   : > { %v518_v24 = vpop.xlane.xlu1 %517  ;;  %v515_v25 = vpop.xlane.xlu0 %514 }
  0xfe   : > { %v618_v26 = vadd.f32 %v586_v22, %v518_v24  ;;  %v617_v27 = vadd.f32 %v585_v23, %v515_v25 }
 0x100   : > { %651 = vst.msk [vmem:[#allocation2 + $0x68] sm:$0xff] %vm637_vm1, %v618_v26  ;;  %650 = vst.msk [vmem:[#allocation2 + $0x60] sm:$0xff] %vm637_vm1, %v617_v27 }
 0x101   : > { %v524_v30 = vpop.xlane.xlu1 %523  ;;  %v521_v31 = vpop.xlane.xlu0 %520 }
 0x102   : > { %v620_v32 = vadd.f32 %v588_v28, %v524_v30  ;;  %v619_v33 = vadd.f32 %v587_v29, %v521_v31 }
 0x104   : > { %653 = vst.msk [vmem:[#allocation2 + $0x78] sm:$0xff] %vm637_vm1, %v620_v32  ;;  %652 = vst.msk [vmem:[#allocation2 + $0x70] sm:$0xff] %vm637_vm1, %v619_v33 }
 0x105   : > { %v530_v36 = vpop.xlane.xlu1 %529  ;;  %v527_v37 = vpop.xlane.xlu0 %526 }
 0x106   : > { %v622_v38 = vadd.f32 %v590_v34, %v530_v36  ;;  %v621_v39 = vadd.f32 %v589_v35, %v527_v37 }
 0x108   : > { %655 = vst.msk [vmem:[#allocation2 + $0x88] sm:$0xff] %vm637_vm1, %v622_v38  ;;  %654 = vst.msk [vmem:[#allocation2 + $0x80] sm:$0xff] %vm637_vm1, %v621_v39 }
 0x109   : > { %v536_v42 = vpop.xlane.xlu1 %535  ;;  %v533_v43 = vpop.xlane.xlu0 %532 }
 0x10a   : > { %v624_v44 = vadd.f32 %v592_v40, %v536_v42  ;;  %v623_v45 = vadd.f32 %v591_v41, %v533_v43 }
 0x10c   : > { %657 = vst.msk [vmem:[#allocation2 + $0x98] sm:$0xff] %vm637_vm1, %v624_v44  ;;  %656 = vst.msk [vmem:[#allocation2 + $0x90] sm:$0xff] %vm637_vm1, %v623_v45 }
 0x10d   : > { %v542_v48 = vpop.xlane.xlu1 %541  ;;  %v539_v49 = vpop.xlane.xlu0 %538 }
 0x10e   : > { %v626_v50 = vadd.f32 %v594_v46, %v542_v48  ;;  %v625_v51 = vadd.f32 %v593_v47, %v539_v49 }
 0x110   : > { %659 = vst.msk [vmem:[#allocation2 + $0xa8] sm:$0xff] %vm637_vm1, %v626_v50  ;;  %658 = vst.msk [vmem:[#allocation2 + $0xa0] sm:$0xff] %vm637_vm1, %v625_v51 }
 0x111   : > { %v548_v16 = vpop.xlane.xlu1 %547  ;;  %v545_v54 = vpop.xlane.xlu0 %544 }
 0x112   : > { %v628_v55 = vadd.f32 %v596_v52, %v548_v16  ;;  %v627_v56 = vadd.f32 %v595_v53, %v545_v54 }
 0x114   : > { %661 = vst.msk [vmem:[#allocation2 + $0xb8] sm:$0xff] %vm637_vm1, %v628_v55  ;;  %660 = vst.msk [vmem:[#allocation2 + $0xb0] sm:$0xff] %vm637_vm1, %v627_v56 }
 0x115   : > { %v554_v59 = vpop.xlane.xlu1 %553  ;;  %v551_v60 = vpop.xlane.xlu0 %550 }
 0x116   : > { %v630_v61 = vadd.f32 %v598_v57, %v554_v59  ;;  %v629_v62 = vadd.f32 %v597_v58, %v551_v60 }
 0x118   : > { %663 = vst.msk [vmem:[#allocation2 + $0xc8] sm:$0xff] %vm637_vm1, %v630_v61  ;;  %662 = vst.msk [vmem:[#allocation2 + $0xc0] sm:$0xff] %vm637_vm1, %v629_v62 }
 0x119   : > { %v560_v1 = vpop.xlane.xlu1 %559  ;;  %v557_v2 = vpop.xlane.xlu0 %556 }
 0x11a   : > { %v632_v3 = vadd.f32 %v600_v63, %v560_v1  ;;  %v631_v4 = vadd.f32 %v599_v0, %v557_v2 }
 0x11c   : > { %665 = vst.msk [vmem:[#allocation2 + $0xd8] sm:$0xff] %vm637_vm1, %v632_v3  ;;  %664 = vst.msk [vmem:[#allocation2 + $0xd0] sm:$0xff] %vm637_vm1, %v631_v4 }
 0x11d   : > { %v566_v7 = vpop.xlane.xlu1 %565  ;;  %v563_v8 = vpop.xlane.xlu0 %562 }
 0x11e   : > { %v634_v9 = vadd.f32 %v602_v5, %v566_v7  ;;  %v633_v10 = vadd.f32 %v601_v6, %v563_v8 }
 0x120   : > { %667 = vst.msk [vmem:[#allocation2 + $0xe8] sm:$0xff] %vm637_vm1, %v634_v9  ;;  %666 = vst.msk [vmem:[#allocation2 + $0xe0] sm:$0xff] %vm637_vm1, %v633_v10 }
 0x121   : > { %v572_v13 = vpop.xlane.xlu1 %571  ;;  %v569_v14 = vpop.xlane.xlu0 %568 }
 0x122   : > { %v636_v15 = vadd.f32 %v604_v11, %v572_v13  ;;  %v635_v17 = vadd.f32 %v603_v12, %v569_v14 }
 0x124   : > { %669 = vst.msk [vmem:[#allocation2 + $0xf8] sm:$0xff] %vm637_vm1, %v636_v15  ;;  %668 = vst.msk [vmem:[#allocation2 + $0xf0] sm:$0xff] %vm637_vm1, %v635_v17 }
 0x125 PF: > { %v742_v18 = vld [vmem:[#allocation2 + $0x80] sm:$0xff]  ;;  %v2701_v21 = vmov 0   ;;  %v671_v22 = vld [vmem:[%s2865_s17 + $0x8] sm:$0xff]  ;;  %v672_v24 = vld [vmem:[%s2865_s17 + $0x10] sm:$0xff]  ;;  %vm1769_vm2 = vcmask 523264   ;;  %vm2703_vm3 = vmmov 0  }
 0x126   : > { %v726_v19 = vld [vmem:[#allocation2] sm:$0xff]  ;;  %2554 = vset.pattern.permute.xlu1 %v2701_v21  ;;  %2553 = vset.pattern.permute.xlu0 %v2701_v21  ;;  %v673_v25 = vld [vmem:[%s2865_s17 + $0x18] sm:$0xff]  ;;  %v743_v26 = vld [vmem:[#allocation2 + $0x88] sm:$0xff] }
 0x127   : > { %v670_v20 = vld [vmem:[%s2865_s17] sm:$0xff]  ;;  %840 = vperm.xlu0 %2553, %v742_v18   ;;  %760 = vperm.xlu1 %2554, %v726_v19   ;;  %v727_v27 = vld [vmem:[#allocation2 + $0x8] sm:$0xff]  ;;  %v687_v28 = vpack.c.bf16 %v673_v25, %v672_v24  ;;  %v744_v31 = vld [vmem:[#allocation2 + $0x90] sm:$0xff] }
 0x128   : > { %v686_v23 = vpack.c.bf16 %v671_v22, %v670_v20  ;;  %v674_v29 = vld [vmem:[%s2865_s17 + $0x20] sm:$0xff]  ;;  %v675_v30 = vld [vmem:[%s2865_s17 + $0x28] sm:$0xff]  ;;  %v745_v32 = vld [vmem:[#allocation2 + $0x98] sm:$0xff] }
 0x129   : > { %v688_v33 = vpack.c.bf16 %v675_v30, %v674_v29  ;;  %v676_v34 = vld [vmem:[%s2865_s17 + $0x30] sm:$0xff]  ;;  %v677_v35 = vld [vmem:[%s2865_s17 + $0x38] sm:$0xff]  ;;  %v678_v38 = vld [vmem:[%s2865_s17 + $0x40] sm:$0xff] }
 0x12a   : > { %2379 = vmatprep.subr.bf16.mxu0 %v686_v23  ;;  %v728_v36 = vld [vmem:[#allocation2 + $0x10] sm:$0xff]  ;;  %v729_v37 = vld [vmem:[#allocation2 + $0x18] sm:$0xff]  ;;  %v689_v39 = vpack.c.bf16 %v677_v35, %v676_v34  ;;  %v679_v40 = vld [vmem:[%s2865_s17 + $0x48] sm:$0xff] }
 0x12b   : > { %2380 = vmatpush3.bf16.msra.mxu0 %v686_v23  ;;  %845 = vperm.xlu0 %2553, %v743_v26   ;;  %v2555_v41 = vld [vmem:[#allocation5] ss:$8 sps:$4 sm:$0xff]   ;;  %v690_v44 = vpack.c.bf16 %v679_v40, %v678_v38  ;;  %v680_v45 = vld [vmem:[%s2865_s17 + $0x50] sm:$0xff]  ;;  %v681_v46 = vld [vmem:[%s2865_s17 + $0x58] sm:$0xff] }
 0x12c   : > { %765 = vperm.xlu1 %2554, %v727_v27   ;;  %2381 = vmatprep.subr.bf16.mxu0 %v687_v28  ;;  %v746_v42 = vld [vmem:[#allocation2 + $0xa0] sm:$0xff]  ;;  %v747_v43 = vld [vmem:[#allocation2 + $0xa8] sm:$0xff]  ;;  %v691_v49 = vpack.c.bf16 %v681_v46, %v680_v45  ;;  %v748_v52 = vld [vmem:[#allocation2 + $0xb0] sm:$0xff] }
 0x12d   : > { %2395 = vmatprep.mubr.bf16.mxu0 %v2555_v41  ;;  %v730_v47 = vld [vmem:[#allocation2 + $0x20] sm:$0xff]  ;;  %v731_v48 = vld [vmem:[#allocation2 + $0x28] sm:$0xff]  ;;  %v749_v53 = vld [vmem:[#allocation2 + $0xb8] sm:$0xff] }
 0x12e   : > { %v682_v50 = vld [vmem:[%s2865_s17 + $0x60] sm:$0xff]  ;;  %v683_v51 = vld [vmem:[%s2865_s17 + $0x68] sm:$0xff]  ;;  %v684_v54 = vld [vmem:[%s2865_s17 + $0x70] sm:$0xff] }
 0x12f   : > { %2382 = vmatpush3.bf16.msra.mxu0 %v687_v28  ;;  %850 = vperm.xlu0 %2553, %v744_v31   ;;  %v692_v16 = vpack.c.bf16 %v683_v51, %v682_v50  ;;  %v685_v55 = vld [vmem:[%s2865_s17 + $0x78] sm:$0xff]  ;;  %v732_v56 = vld [vmem:[#allocation2 + $0x30] sm:$0xff]  ;;  %v750_v59 = vld [vmem:[#allocation2 + $0xc0] sm:$0xff] }
 0x130   : > { %855 = vperm.xlu1 %2554, %v745_v32   ;;  %2383 = vmatprep.subr.bf16.mxu0 %v688_v33  ;;  %v733_v57 = vld [vmem:[#allocation2 + $0x38] sm:$0xff]  ;;  %v693_v58 = vpack.c.bf16 %v685_v55, %v684_v54  ;;  %v751_v60 = vld [vmem:[#allocation2 + $0xc8] sm:$0xff]  ;;  %v734_v63 = vld [vmem:[#allocation2 + $0x40] sm:$0xff] }
 0x131   : > { %v2556_v61 = vld [vmem:[#allocation5 + $0x10] ss:$8 sps:$4 sm:$0xff]   ;;  %v2557_v62 = vld [vmem:[#allocation5 + $0x20] ss:$8 sps:$4 sm:$0xff]  }
 0x132   : > { %v735_v0 = vld [vmem:[#allocation2 + $0x48] sm:$0xff]  ;;  %v752_v1 = vld [vmem:[#allocation2 + $0xd0] sm:$0xff]  ;;  %v753_v2 = vld [vmem:[#allocation2 + $0xd8] sm:$0xff] }
 0x133   : > { %2384 = vmatpush3.bf16.msra.mxu0 %v688_v33  ;;  %770 = vperm.xlu0 %2553, %v728_v36   ;;  %v2558_v3 = vld [vmem:[#allocation5 + $0x30] ss:$8 sps:$4 sm:$0xff]   ;;  %v2559_v4 = vld [vmem:[#allocation5 + $0x40] ss:$8 sps:$4 sm:$0xff]  }
 0x134   : > { %775 = vperm.xlu1 %2554, %v729_v37   ;;  %2385 = vmatprep.subr.bf16.mxu0 %v689_v39  ;;  %v736_v5 = vld [vmem:[#allocation2 + $0x50] sm:$0xff]  ;;  %v737_v6 = vld [vmem:[#allocation2 + $0x58] sm:$0xff]  ;;  %v754_v7 = vld [vmem:[#allocation2 + $0xe0] sm:$0xff] }
 0x135   : > { %v755_v8 = vld [vmem:[#allocation2 + $0xe8] sm:$0xff]  ;;  %v2560_v9 = vld [vmem:[#allocation5 + $0x50] ss:$8 sps:$4 sm:$0xff]   ;;  %v738_v11 = vld [vmem:[#allocation2 + $0x60] sm:$0xff] }
 0x136   : > { %v2561_v10 = vld [vmem:[#allocation5 + $0x60] ss:$8 sps:$4 sm:$0xff]   ;;  %v756_v13 = vld [vmem:[#allocation2 + $0xf0] sm:$0xff]  ;;  %v757_v14 = vld [vmem:[#allocation2 + $0xf8] sm:$0xff] }
 0x137   : > { %2386 = vmatpush3.bf16.msra.mxu0 %v689_v39  ;;  %860 = vperm.xlu0 %2553, %v746_v42   ;;  %v739_v12 = vld [vmem:[#allocation2 + $0x68] sm:$0xff]  ;;  %v2562_v15 = vld [vmem:[#allocation5 + $0x70] ss:$8 sps:$4 sm:$0xff]   ;;  %v1239_v20 = vld [vmem:[%s3467_s4 + $0x100] sm:$0xff] }
 0x138   : > { %865 = vperm.xlu1 %2554, %v747_v43   ;;  %2387 = vmatprep.subr.bf16.mxu0 %v690_v44  ;;  %v2563_v17 = vld [vmem:[#allocation5 + $0x80] ss:$8 sps:$4 sm:$0xff]   ;;  %v740_v18 = vld [vmem:[#allocation2 + $0x70] sm:$0xff]  ;;  %v741_v19 = vld [vmem:[#allocation2 + $0x78] sm:$0xff] }
 0x139   : > { %v1240_v21 = vld [vmem:[%s3467_s4 + $0x108] sm:$0xff]  ;;  %v2564_v22 = vld [vmem:[#allocation5 + $0x90] ss:$8 sps:$4 sm:$0xff]   ;;  %v1243_v26 = vld [vmem:[%s3467_s4 + $0x120] sm:$0xff] }
 0x13a   : > { %v2565_v23 = vld [vmem:[#allocation5 + $0xa0] ss:$8 sps:$4 sm:$0xff]   ;;  %v1241_v24 = vld [vmem:[%s3467_s4 + $0x110] sm:$0xff]  ;;  %v1242_v25 = vld [vmem:[%s3467_s4 + $0x118] sm:$0xff] }
 0x13b   : > { %2388 = vmatpush3.bf16.msra.mxu0 %v690_v44  ;;  %780 = vperm.xlu0 %2553, %v730_v47   ;;  %v1244_v27 = vld [vmem:[%s3467_s4 + $0x128] sm:$0xff]  ;;  %v2566_v28 = vld [vmem:[#allocation5 + $0xb0] ss:$8 sps:$4 sm:$0xff]   ;;  %v1247_v32 = vld [vmem:[%s3467_s4 + $0x140] sm:$0xff] }
 0x13c   : > { %785 = vperm.xlu1 %2554, %v731_v48   ;;  %2389 = vmatprep.subr.bf16.mxu0 %v691_v49  ;;  %v2567_v29 = vld [vmem:[#allocation5 + $0xc0] ss:$8 sps:$4 sm:$0xff]   ;;  %v1245_v30 = vld [vmem:[%s3467_s4 + $0x130] sm:$0xff]  ;;  %v1246_v31 = vld [vmem:[%s3467_s4 + $0x138] sm:$0xff] }
 0x13d   : > { %v1248_v33 = vld [vmem:[%s3467_s4 + $0x148] sm:$0xff]  ;;  %v2568_v34 = vld [vmem:[#allocation5 + $0xd0] ss:$8 sps:$4 sm:$0xff]   ;;  %v1251_v38 = vld [vmem:[%s3467_s4 + $0x160] sm:$0xff] }
 0x13e   : > { %v2569_v35 = vld [vmem:[#allocation5 + $0xe0] ss:$8 sps:$4 sm:$0xff]   ;;  %v1249_v36 = vld [vmem:[%s3467_s4 + $0x150] sm:$0xff]  ;;  %v1250_v37 = vld [vmem:[%s3467_s4 + $0x158] sm:$0xff] }
 0x13f   : > { %2390 = vmatpush3.bf16.msra.mxu0 %v691_v49  ;;  %870 = vperm.xlu0 %2553, %v748_v52   ;;  %v1252_v39 = vld [vmem:[%s3467_s4 + $0x168] sm:$0xff]  ;;  %v2570_v40 = vld [vmem:[#allocation5 + $0xf0] ss:$8 sps:$4 sm:$0xff]   ;;  %v1544_v43 = vld [vmem:[%s3467_s4 + $0x180] sm:$0xff] }
 0x140   : > { %875 = vperm.xlu1 %2554, %v749_v53   ;;  %2391 = vmatprep.subr.bf16.mxu0 %v692_v16  ;;  %v1253_v41 = vld [vmem:[%s3467_s4 + $0x170] sm:$0xff]  ;;  %v1254_v42 = vld [vmem:[%s3467_s4 + $0x178] sm:$0xff]  ;;  %v1545_v44 = vld [vmem:[%s3467_s4 + $0x188] sm:$0xff] }
 0x141   : > { %v1546_v45 = vld [vmem:[%s3467_s4 + $0x190] sm:$0xff]  ;;  %v1547_v46 = vld [vmem:[%s3467_s4 + $0x198] sm:$0xff]  ;;  %v1548_v47 = vld [vmem:[%s3467_s4 + $0x1a0] sm:$0xff] }
 0x142   : > { %v1549_v48 = vld [vmem:[%s3467_s4 + $0x1a8] sm:$0xff]  ;;  %v1550_v49 = vld [vmem:[%s3467_s4 + $0x1b0] sm:$0xff]  ;;  %v1551_v50 = vld [vmem:[%s3467_s4 + $0x1b8] sm:$0xff] }
 0x143   : > { %2392 = vmatpush3.bf16.msra.mxu0 %v692_v16  ;;  %790 = vperm.xlu0 %2553, %v732_v56   ;;  %v1701_v51 = vld [vmem:[%s3467_s4 + $0x1c0] sm:$0xff]  ;;  %v1702_v52 = vld [vmem:[%s3467_s4 + $0x1c8] sm:$0xff]  ;;  %v1703_v53 = vld [vmem:[%s3467_s4 + $0x1d0] sm:$0xff] }
 0x144   : > { %795 = vperm.xlu1 %2554, %v733_v57   ;;  %2393 = vmatprep.subr.bf16.mxu0 %v693_v58  ;;  %v1704_v16 = vld [vmem:[%s3467_s4 + $0x1d8] sm:$0xff]  ;;  %v1705_v54 = vld [vmem:[%s3467_s4 + $0x1e0] sm:$0xff]  ;;  %v1706_v55 = vld [vmem:[%s3467_s4 + $0x1e8] sm:$0xff] }
 0x145   : > { %v1707_v56 = vld [vmem:[%s3467_s4 + $0x1f0] sm:$0xff]  ;;  %v1708_v57 = vld [vmem:[%s3467_s4 + $0x1f8] sm:$0xff] }
 0x147   : > { %2394 = vmatpush3.bf16.msra.mxu0 %v693_v58  ;;  %880 = vperm.xlu0 %2553, %v750_v59   ;;  %v1861_v58 = vld [vmem:[%s3467_s4 + $0x200] sm:$0xff]  ;;  %v1862_v59 = vld [vmem:[%s3467_s4 + $0x208] sm:$0xff] }
 0x148   : > { %885 = vperm.xlu1 %2554, %v751_v60  }
 0x14a   : > { %2396 = vmatmul.mubr.bf16.vlgmr.msra.gmra.mrb[0].mxu0 %v2556_v61 }
 0x14b   : > { %2399 = vmatprep.mubr.bf16.mxu0 %v2557_v62  ;;  %800 = vperm.xlu0 %2553, %v734_v63  }
 0x14c   : > { %805 = vperm.xlu1 %2554, %v735_v0   ;;  %v2573_v0 = vld [vmem:[#allocation5 + $0x104] ss:$8 sps:$4 sm:$0xff]  }
 0x14d   : > { %1447 = vmatprep.mubr.bf16.mxu1 %v2573_v0 }
 0x14f   : > { %890 = vperm.xlu0 %2553, %v752_v1  }
 0x150   : > { %895 = vperm.xlu1 %2554, %v753_v2  }
 0x152   : > { %2400 = vmatmul.mubr.bf16.gmra.mrb[4].mxu0 %v2558_v3 }
 0x153   : > { %2403 = vmatprep.mubr.bf16.mxu0 %v2559_v4  ;;  %810 = vperm.xlu0 %2553, %v736_v5  }
 0x154   : > { %815 = vperm.xlu1 %2554, %v737_v6  }
 0x157   : > { %900 = vperm.xlu0 %2553, %v754_v7  }
 0x158   : > { %905 = vperm.xlu1 %2554, %v755_v8  }
 0x15a   : > { %2404 = vmatmul.mubr.bf16.gmra.mrb[8].mxu0 %v2560_v9 }
 0x15b   : > { %2407 = vmatprep.mubr.bf16.mxu0 %v2561_v10  ;;  %820 = vperm.xlu0 %2553, %v738_v11  }
 0x15c   : > { %825 = vperm.xlu1 %2554, %v739_v12  }
 0x15f   : > { %910 = vperm.xlu0 %2553, %v756_v13  }
 0x160   : > { %915 = vperm.xlu1 %2554, %v757_v14  }
 0x162   : > { %2408 = vmatmul.mubr.bf16.gmra.mrb[12].mxu0 %v2562_v15 }
 0x163   : > { %2411 = vmatprep.mubr.bf16.mxu0 %v2563_v17  ;;  %830 = vperm.xlu0 %2553, %v740_v18  }
 0x164   : > { %835 = vperm.xlu1 %2554, %v741_v19  }
 0x167   : > { %1257 = vperm.xlu0 %2553, %v1239_v20  }
 0x168   : > { %1262 = vperm.xlu1 %2554, %v1240_v21  }
 0x16a   : > { %2412 = vmatmul.mubr.bf16.gmra.mrb[16].mxu0 %v2564_v22 }
 0x16b   : > { %2415 = vmatprep.mubr.bf16.mxu0 %v2565_v23  ;;  %1267 = vperm.xlu0 %2553, %v1241_v24  }
 0x16c   : > { %1272 = vperm.xlu1 %2554, %v1242_v25  }
 0x16f   : > { %1277 = vperm.xlu0 %2553, %v1243_v26  }
 0x170   : > { %1282 = vperm.xlu1 %2554, %v1244_v27  }
 0x172   : > { %2416 = vmatmul.mubr.bf16.gmra.mrb[20].mxu0 %v2566_v28 }
 0x173   : > { %2419 = vmatprep.mubr.bf16.mxu0 %v2567_v29  ;;  %1287 = vperm.xlu0 %2553, %v1245_v30  }
 0x174   : > { %1292 = vperm.xlu1 %2554, %v1246_v31  }
 0x177   : > { %1297 = vperm.xlu0 %2553, %v1247_v32  }
 0x178   : > { %1302 = vperm.xlu1 %2554, %v1248_v33  }
 0x17a   : > { %2420 = vmatmul.mubr.bf16.gmra.mrb[24].mxu0 %v2568_v34 }
 0x17b   : > { %2423 = vmatprep.mubr.bf16.mxu0 %v2569_v35  ;;  %1307 = vperm.xlu0 %2553, %v1249_v36  }
 0x17c   : > { %1312 = vperm.xlu1 %2554, %v1250_v37  }
 0x17f   : > { %1317 = vperm.xlu0 %2553, %v1251_v38  }
 0x180   : > { %1322 = vperm.xlu1 %2554, %v1252_v39  }
 0x182   : > { %2424 = vmatmul.mubr.bf16.gmra.mrb[28].mxu0 %v2570_v40 }
 0x183   : > { %1327 = vperm.xlu0 %2553, %v1253_v41  }
 0x184   : > { %1332 = vperm.xlu1 %2554, %v1254_v42  }
 0x187   : > { %1554 = vperm.xlu0 %2553, %v1544_v43  }
 0x188   : > { %1559 = vperm.xlu1 %2554, %v1545_v44  }
 0x18b   : > { %1564 = vperm.xlu0 %2553, %v1546_v45  }
 0x18c   : > { %1569 = vperm.xlu1 %2554, %v1547_v46  }
 0x18f   : > { %1574 = vperm.xlu0 %2553, %v1548_v47  }
 0x190   : > { %1579 = vperm.xlu1 %2554, %v1549_v48  }
 0x193   : > { %1584 = vperm.xlu0 %2553, %v1550_v49  }
 0x194   : > { %1589 = vperm.xlu1 %2554, %v1551_v50  }
 0x197   : > { %1711 = vperm.xlu0 %2553, %v1701_v51  }
 0x198   : > { %1716 = vperm.xlu1 %2554, %v1702_v52  }
 0x19b   : > { %1721 = vperm.xlu0 %2553, %v1703_v53  }
 0x19c   : > { %1726 = vperm.xlu1 %2554, %v1704_v16  }
 0x19f   : > { %1731 = vperm.xlu0 %2553, %v1705_v54  }
 0x1a0   : > { %1736 = vperm.xlu1 %2554, %v1706_v55  }
 0x1a3   : > { %1741 = vperm.xlu0 %2553, %v1707_v56  }
 0x1a4   : > { %1746 = vperm.xlu1 %2554, %v1708_v57  }
 0x1a6   : > { %v3294_v60 = vpop.permute.xlu0 %840  ;;  %v761_v61 = vpop.permute.xlu1 %760 }
 0x1a7   : > { %1865 = vperm.xlu0 %2553, %v1861_v58  }
 0x1a8   : > { %1870 = vperm.xlu1 %2554, %v1862_v59  }
 0x1aa   : > { %v3296_v62 = vpop.permute.xlu0 %845 }
 0x1ab   : > { %v766_v63 = vpop.permute.xlu1 %765 }
 0x1ae   : > { %v3298_v1 = vpop.permute.xlu0 %850 }
 0x1af   : > { %v3300_v2 = vpop.permute.xlu1 %855 }
 0x1b2   : > { %v771_v3 = vpop.permute.xlu0 %770 }
 0x1b3   : > { %v776_v4 = vpop.permute.xlu1 %775 }
 0x1b6   : > { %v3302_v5 = vpop.permute.xlu0 %860 }
 0x1b7   : > { %v3304_v6 = vpop.permute.xlu1 %865 }
 0x1ba   : > { %v781_v7 = vpop.permute.xlu0 %780 }
 0x1bb   : > { %v786_v8 = vpop.permute.xlu1 %785 }
 0x1be   : > { %v3306_v9 = vpop.permute.xlu0 %870 }
 0x1bf   : > { %v3308_v10 = vpop.permute.xlu1 %875 }
 0x1c2   : > { %v791_v11 = vpop.permute.xlu0 %790 }
 0x1c3   : > { %v796_v12 = vpop.permute.xlu1 %795 }
 0x1c6   : > { %v3310_v13 = vpop.permute.xlu0 %880 }
 0x1c7   : > { %v3312_v14 = vpop.permute.xlu1 %885 }
 0x1ca   : > { %v801_v15 = vpop.permute.xlu0 %800 }
 0x1cb   : > { %v806_v17 = vpop.permute.xlu1 %805 }
 0x1ce   : > { %v3314_v18 = vpop.permute.xlu0 %890 }
 0x1cf   : > { %v3316_v19 = vpop.permute.xlu1 %895 }
 0x1d2   : > { %v811_v20 = vpop.permute.xlu0 %810 }
 0x1d3   : > { %v816_v24 = vpop.permute.xlu1 %815 }
 0x1d6   : > { %v3318_v32 = vpop.permute.xlu0 %900 }
 0x1d7   : > { %v3322_v36 = vpop.permute.xlu1 %905 }
 0x1da   : > { %v821_v45 = vpop.permute.xlu0 %820 }
 0x1db   : > { %v826_v49 = vpop.permute.xlu1 %825 }
 0x1de   : > { %v3330_v56 = vpop.permute.xlu0 %910 }
 0x21d   : > { %v2397_v21 = vpop.f32.mrb[0].mxu0 }
 0x21e   : > { %v1057_v22 = vadd.f32 %v2397_v21, %v771_v3  ;;  %v1048_v23 = vpop.f32.mrb[1].mxu0 }
 0x21f   : > { %v1049_v25 = vadd.f32 %v1048_v23, %v761_v61  ;;  %v2398_v26 = vpop.f32.mrb[2].mxu0 }
 0x220   : > { %v1060_v27 = vadd.f32 %v2398_v26, %v776_v4  ;;  %v1051_v28 = vpop.f32.mrb[3].mxu0  ;;  %v1177_v30 = vmax.f32 %v1057_v22, 0.0 }
 0x221   : > { %v1052_v29 = vadd.f32 %v1051_v28, %v766_v63  ;;  %v1175_v33 = vmax.f32 %v1049_v25, 0.0  ;;  %v3332_v63 = vpop.permute.xlu1 %915 }
 0x222   : > { %v1178_v31 = vmax.f32 %v1060_v27, 0.0 }
 0x223   : > { %v1176_v34 = vmax.f32 %v1052_v29, 0.0 }
 0x224   : > { %v3320_v35 = vpack.c.bf16 %v1178_v31, %v1177_v30 }
 0x225   : > { %v2401_v37 = vpop.f32.mrb[4].mxu0  ;;  %v3324_v38 = vpack.c.bf16 %v1176_v34, %v1175_v33  ;;  %v836_v25 = vpop.permute.xlu1 %835 }
 0x226   : > { %v1073_v39 = vadd.f32 %v2401_v37, %v791_v11  ;;  %v1064_v40 = vpop.f32.mrb[5].mxu0 }
 0x227   : > { %v1065_v41 = vadd.f32 %v1064_v40, %v781_v7  ;;  %v2402_v42 = vpop.f32.mrb[6].mxu0 }
 0x228   : > { %v1076_v43 = vadd.f32 %v2402_v42, %v796_v12  ;;  %v1067_v44 = vpop.f32.mrb[7].mxu0  ;;  %v1181_v47 = vmax.f32 %v1073_v39, 0.0  ;;  %v831_v12 = vpop.permute.xlu0 %830 }
 0x229   : > { %v1068_v46 = vadd.f32 %v1067_v44, %v786_v8  ;;  %v1179_v50 = vmax.f32 %v1065_v41, 0.0 }
 0x22a   : > { %v1182_v48 = vmax.f32 %v1076_v43, 0.0 }
 0x22b   : > { %v1180_v51 = vmax.f32 %v1068_v46, 0.0 }
 0x22c   : > { %v3326_v52 = vpack.c.bf16 %v1182_v48, %v1181_v47 }
 0x22d   : > { %v3328_v53 = vpack.c.bf16 %v1180_v51, %v1179_v50  ;;  %v2405_v16 = vpop.f32.mrb[8].mxu0 }
 0x22e   : > { %v1089_v54 = vadd.f32 %v2405_v16, %v811_v20  ;;  %v1080_v55 = vpop.f32.mrb[9].mxu0 }
 0x22f   : > { %v1081_v57 = vadd.f32 %v1080_v55, %v801_v15  ;;  %v2406_v58 = vpop.f32.mrb[10].mxu0 }
 0x230   : > { %v1092_v59 = vadd.f32 %v2406_v58, %v816_v24  ;;  %v1083_v61 = vpop.f32.mrb[11].mxu0  ;;  %v1185_v3 = vmax.f32 %v1089_v54, 0.0 }
 0x231   : > { %v1084_v0 = vadd.f32 %v1083_v61, %v806_v17  ;;  %v1183_v7 = vmax.f32 %v1081_v57, 0.0 }
 0x232   : > { %v1186_v4 = vmax.f32 %v1092_v59, 0.0 }
 0x233   : > { %v1184_v8 = vmax.f32 %v1084_v0, 0.0 }
 0x234   : > { %v3334_v11 = vpack.c.bf16 %v1186_v4, %v1185_v3 }
 0x235   : > { %v3336_v21 = vpack.c.bf16 %v1184_v8, %v1183_v7  ;;  %v2409_v20 = vpop.f32.mrb[12].mxu0 }
 0x236   : > { %v1105_v22 = vadd.f32 %v2409_v20, %v831_v12  ;;  %v1096_v23 = vpop.f32.mrb[13].mxu0 }
 0x237   : > { %v1097_v15 = vadd.f32 %v1096_v23, %v821_v45  ;;  %v2410_v26 = vpop.f32.mrb[14].mxu0 }
 0x238   : > { %v1108_v24 = vadd.f32 %v2410_v26, %v836_v25  ;;  %v1099_v27 = vpop.f32.mrb[15].mxu0  ;;  %v1189_v29 = vmax.f32 %v1105_v22, 0.0 }
 0x239   : > { %v1100_v28 = vadd.f32 %v1099_v27, %v826_v49  ;;  %v1187_v30 = vmax.f32 %v1097_v15, 0.0 }
 0x23a   : > { %v1190_v17 = vmax.f32 %v1108_v24, 0.0 }
 0x23b   : > { %v1188_v31 = vmax.f32 %v1100_v28, 0.0 }
 0x23c   : > { %v3338_v33 = vpack.c.bf16 %v1190_v17, %v1189_v29 }
 0x23d   : > { %v3340_v34 = vpack.c.bf16 %v1188_v31, %v1187_v30  ;;  %v2413_v37 = vpop.f32.mrb[16].mxu0  ;;  %v2579_v31 = vld [vmem:[#allocation5 + $0x120] ss:$8 sps:$4 sm:$0xff]  }
 0x23e   : > { %v1121_v39 = vadd.f32 %v2413_v37, %v3298_v1  ;;  %v1112_v40 = vpop.f32.mrb[17].mxu0  ;;  %v2580_v37 = vld [vmem:[#allocation5 + $0x134] ss:$8 sps:$4 sm:$0xff]  }
 0x23f   : > { %v1113_v41 = vadd.f32 %v1112_v40, %v3294_v60  ;;  %v2414_v42 = vpop.f32.mrb[18].mxu0  ;;  %v2586_v40 = vld [vmem:[#allocation5 + $0x154] ss:$8 sps:$4 sm:$0xff]  }
 0x240   : > { %v1124_v43 = vadd.f32 %v2414_v42, %v3300_v2  ;;  %v1115_v44 = vpop.f32.mrb[19].mxu0  ;;  %v1193_v46 = vmax.f32 %v1121_v39, 0.0  ;;  %v2583_v39 = vld [vmem:[#allocation5 + $0x144] ss:$8 sps:$4 sm:$0xff]   ;;  %v2591_v42 = vld [vmem:[#allocation5 + $0x160] ss:$8 sps:$4 sm:$0xff]  }
 0x241   : > { %v1116_v45 = vadd.f32 %v1115_v44, %v3296_v62  ;;  %v1191_v48 = vmax.f32 %v1113_v41, 0.0  ;;  %v2589_v41 = vld [vmem:[#allocation5 + $0x164] ss:$8 sps:$4 sm:$0xff]   ;;  %v2594_v44 = vld [vmem:[#allocation5 + $0x170] ss:$8 sps:$4 sm:$0xff]  }
 0x242   : > { %v1194_v47 = vmax.f32 %v1124_v43, 0.0  ;;  %v2592_v43 = vld [vmem:[#allocation5 + $0x174] ss:$8 sps:$4 sm:$0xff]  }
 0x243   : > { %v1192_v49 = vmax.f32 %v1116_v45, 0.0  ;;  %v2595_v45 = vld [vmem:[#allocation5 + $0x180] ss:$8 sps:$4 sm:$0xff]  }
 0x244   : > { %v1232_v50 = vpack.c.bf16 %v1194_v47, %v1193_v46  ;;  %2443 = vmatprep.mubr.bf16.mxu0 %v2595_v45 }
 0x245   : > { %v2417_v51 = vpop.f32.mrb[20].mxu0  ;;  %v1231_v16 = vpack.c.bf16 %v1192_v49, %v1191_v48 }
 0x246   : > { %v1137_v54 = vadd.f32 %v2417_v51, %v3306_v9  ;;  %v1128_v55 = vpop.f32.mrb[21].mxu0 }
 0x247   : > { %v1129_v1 = vadd.f32 %v1128_v55, %v3302_v5  ;;  %v2418_v57 = vpop.f32.mrb[22].mxu0  ;;  %2290 = vmatprep.subr.bf16.mxu1 %v1231_v16  ;;  %v1263_v55 = vpop.permute.xlu1 %1262 }
 0x248   : > { %v1140_v60 = vadd.f32 %v2418_v57, %v3308_v10  ;;  %v1131_v2 = vpop.f32.mrb[23].mxu0  ;;  %2291 = vmatpush3.bf16.msra.mxu1 %v3324_v38  ;;  %v1197_v58 = vmax.f32 %v1137_v54, 0.0 }
 0x249   : > { %v1132_v62 = vadd.f32 %v1131_v2, %v3304_v6  ;;  %2292 = vmatprep.subr.bf16.mxu1 %v1232_v50  ;;  %v1195_v61 = vmax.f32 %v1129_v1, 0.0  ;;  %v1258_v50 = vpop.permute.xlu0 %1257 }
 0x24a   : > { %v1198_v59 = vmax.f32 %v1140_v60, 0.0 }
 0x24b   : > { %v1196_v0 = vmax.f32 %v1132_v62, 0.0 }
 0x24c   : > { %v1234_v3 = vpack.c.bf16 %v1198_v59, %v1197_v58  ;;  %2293 = vmatpush3.bf16.msra.mxu1 %v3320_v35 }
 0x24d   : > { %v1233_v9 = vpack.c.bf16 %v1196_v0, %v1195_v61  ;;  %v2421_v4 = vpop.f32.mrb[24].mxu0  ;;  %v1268_v0 = vpop.permute.xlu0 %1267 }
 0x24e   : > { %v1153_v5 = vadd.f32 %v2421_v4, %v3314_v18  ;;  %v1144_v7 = vpop.f32.mrb[25].mxu0 }
 0x24f   : > { %v1145_v10 = vadd.f32 %v1144_v7, %v3310_v13  ;;  %v2422_v8 = vpop.f32.mrb[26].mxu0  ;;  %2294 = vmatprep.subr.bf16.mxu1 %v1233_v9 }
 0x250   : > { %v1156_v38 = vadd.f32 %v2422_v8, %v3316_v19  ;;  %v1147_v6 = vpop.f32.mrb[27].mxu0  ;;  %2295 = vmatpush3.bf16.msra.mxu1 %v3328_v53  ;;  %v1201_v20 = vmax.f32 %v1153_v5, 0.0  ;;  %v1273_v5 = vpop.permute.xlu1 %1272 }
 0x251   : > { %v1148_v12 = vadd.f32 %v1147_v6, %v3312_v14  ;;  %2296 = vmatprep.subr.bf16.mxu1 %v1234_v3  ;;  %v1199_v35 = vmax.f32 %v1145_v10, 0.0 }
 0x252   : > { %v1202_v22 = vmax.f32 %v1156_v38, 0.0 }
 0x253   : > { %v1200_v23 = vmax.f32 %v1148_v12, 0.0 }
 0x254   : > { %v1236_v25 = vpack.c.bf16 %v1202_v22, %v1201_v20  ;;  %2297 = vmatpush3.bf16.msra.mxu1 %v3326_v52 }
 0x255   : > { %v1235_v18 = vpack.c.bf16 %v1200_v23, %v1199_v35  ;;  %v2425_v15 = vpop.f32.mrb[28].mxu0  ;;  %v1278_v35 = vpop.permute.xlu0 %1277 }
 0x256   : > { %v1169_v13 = vadd.f32 %v2425_v15, %v3330_v56  ;;  %v1160_v26 = vpop.f32.mrb[29].mxu0  ;;  %v1283_v15 = vpop.permute.xlu1 %1282 }
 0x257   : > { %v1161_v19 = vadd.f32 %v1160_v26, %v3318_v32  ;;  %v2426_v24 = vpop.f32.mrb[30].mxu0  ;;  %2298 = vmatprep.subr.bf16.mxu1 %v1235_v18  ;;  %v2571_v32 = vld [vmem:[#allocation5 + $0x100] ss:$8 sps:$4 sm:$0xff]  }
 0x258   : > { %v1172_v53 = vadd.f32 %v2426_v24, %v3332_v63  ;;  %v1163_v14 = vpop.f32.mrb[31].mxu0  ;;  %2299 = vmatpush3.bf16.msra.mxu1 %v3336_v21  ;;  %v1205_v28 = vmax.f32 %v1169_v13, 0.0  ;;  %v2574_v63 = vld [vmem:[#allocation5 + $0x114] ss:$8 sps:$4 sm:$0xff]   ;;  %v2577_v21 = vld [vmem:[#allocation5 + $0x124] ss:$8 sps:$4 sm:$0xff]  }
 0x259   : > { %v1164_v27 = vadd.f32 %v1163_v14, %v3322_v36  ;;  %2300 = vmatprep.subr.bf16.mxu1 %v1236_v25  ;;  %v1203_v52 = vmax.f32 %v1161_v19, 0.0  ;;  %v2576_v36 = vld [vmem:[#allocation5 + $0x110] ss:$8 sps:$4 sm:$0xff]  }
 0x25a   : > { %v1206_v29 = vmax.f32 %v1172_v53, 0.0 }
 0x25b   : > { %v1204_v17 = vmax.f32 %v1164_v27, 0.0 }
 0x25c   : > { %v1238_v30 = vpack.c.bf16 %v1206_v29, %v1205_v28  ;;  %2301 = vmatpush3.bf16.msra.mxu1 %v3334_v11  ;;  %v2582_v11 = vld [vmem:[#allocation5 + $0x130] ss:$8 sps:$4 sm:$0xff]   ;;  %v1288_v29 = vpop.permute.xlu0 %1287 }
 0x25d   : > { %v1237_v56 = vpack.c.bf16 %v1204_v17, %v1203_v52 }
 0x25f   : > { %2302 = vmatprep.subr.bf16.mxu1 %v1237_v56  ;;  %v1293_v56 = vpop.permute.xlu1 %1292 }
 0x260   : > { %2303 = vmatpush3.bf16.msra.mxu1 %v3340_v34  ;;  %v2585_v34 = vld [vmem:[#allocation5 + $0x140] ss:$8 sps:$4 sm:$0xff]  }
 0x261   : > { %2304 = vmatprep.subr.bf16.mxu1 %v1238_v30 }
 0x264   : > { %2305 = vmatpush3.bf16.msra.mxu1 %v3338_v33  ;;  %v2588_v33 = vld [vmem:[#allocation5 + $0x150] ss:$8 sps:$4 sm:$0xff]  }
 0x267   : > { %1448 = vmatmul.mubr.bf16.vlgmr.msra.gmra.mrb[0].mxu1 %v2571_v32 }
 0x268   : > { %1455 = vmatprep.mubr.bf16.mxu1 %v2574_v63 }
 0x26f   : > { %1456 = vmatmul.mubr.bf16.gmra.mrb[4].mxu1 %v2576_v36 }
 0x270   : > { %1463 = vmatprep.mubr.bf16.mxu1 %v2577_v21 }
 0x277   : > { %1464 = vmatmul.mubr.bf16.gmra.mrb[8].mxu1 %v2579_v31 }
 0x278   : > { %1471 = vmatprep.mubr.bf16.mxu1 %v2580_v37 }
 0x27f   : > { %1472 = vmatmul.mubr.bf16.gmra.mrb[12].mxu1 %v2582_v11 }
 0x280   : > { %1479 = vmatprep.mubr.bf16.mxu1 %v2583_v39 }
 0x287   : > { %1480 = vmatmul.mubr.bf16.gmra.mrb[16].mxu1 %v2585_v34  ;;  %v1298_v34 = vpop.permute.xlu0 %1297 }
 0x288   : > { %1487 = vmatprep.mubr.bf16.mxu1 %v2586_v40 }
 0x28f   : > { %1488 = vmatmul.mubr.bf16.gmra.mrb[20].mxu1 %v2588_v33 }
 0x290   : > { %1495 = vmatprep.mubr.bf16.mxu1 %v2589_v41 }
 0x297   : > { %1496 = vmatmul.mubr.bf16.gmra.mrb[24].mxu1 %v2591_v42  ;;  %v1303_v42 = vpop.permute.xlu1 %1302 }
 0x298   : > { %1503 = vmatprep.mubr.bf16.mxu1 %v2592_v43 }
 0x29f   : > { %1504 = vmatmul.mubr.bf16.gmra.mrb[28].mxu1 %v2594_v44 }
 0x33a   : > { %v2306_v46 = vpop.f32.mrb[0].mxu1 }
 0x33b   : > { %v2307_v47 = vpop.f32.mrb[1].mxu1 }
 0x33c   : > { %v2308_v48 = vadd.f32 %v2307_v47, %v2306_v46  ;;  %v2309_v49 = vpop.f32.mrb[2].mxu1 }
 0x33d   : > { %v2310_v51 = vpop.f32.mrb[3].mxu1 }
 0x33e   : > { %v1450_v16 = vadd.f32 %v2308_v48, %v1258_v50  ;;  %v2311_v54 = vadd.f32 %v2310_v51, %v2309_v49  ;;  %v1308_v51 = vpop.permute.xlu0 %1307 }
 0x340   : > { %v1453_v1 = vadd.f32 %v2311_v54, %v1263_v55  ;;  %v1512_v57 = vmax.f32 %v1450_v16, 0.0 }
 0x342   : > { %v1513_v60 = vmax.f32 %v1453_v1, 0.0  ;;  %v2312_v2 = vpop.f32.mrb[4].mxu1  ;;  %v1313_v1 = vpop.permute.xlu1 %1312 }
 0x343   : > { %v2313_v62 = vpop.f32.mrb[5].mxu1 }
 0x344   : > { %v2314_v58 = vadd.f32 %v2313_v62, %v2312_v2  ;;  %v2315_v59 = vpop.f32.mrb[6].mxu1  ;;  %v1536_v61 = vpack.c.bf16 %v1513_v60, %v1512_v57 }
 0x345   : > { %v2316_v3 = vpop.f32.mrb[7].mxu1 }
 0x346   : > { %v1458_v9 = vadd.f32 %v2314_v58, %v1268_v0  ;;  %v2317_v4 = vadd.f32 %v2316_v3, %v2315_v59  ;;  %2427 = vmatprep.subr.bf16.mxu0 %v1536_v61  ;;  %v1318_v3 = vpop.permute.xlu0 %1317 }
 0x347   : > { %2428 = vmatpush3.bf16.msra.mxu0 %v1536_v61 }
 0x348   : > { %v1461_v7 = vadd.f32 %v2317_v4, %v1273_v5  ;;  %v1514_v10 = vmax.f32 %v1458_v9, 0.0 }
 0x34a   : > { %v1515_v8 = vmax.f32 %v1461_v7, 0.0  ;;  %v2318_v38 = vpop.f32.mrb[8].mxu1  ;;  %v1323_v7 = vpop.permute.xlu1 %1322 }
 0x34b   : > { %v2319_v6 = vpop.f32.mrb[9].mxu1 }
 0x34c   : > { %v2320_v12 = vadd.f32 %v2319_v6, %v2318_v38  ;;  %v2321_v20 = vpop.f32.mrb[10].mxu1  ;;  %v1537_v22 = vpack.c.bf16 %v1515_v8, %v1514_v10 }
 0x34d   : > { %v2322_v23 = vpop.f32.mrb[11].mxu1 }
 0x34e   : > { %v1466_v25 = vadd.f32 %v2320_v12, %v1278_v35  ;;  %v2323_v18 = vadd.f32 %v2322_v23, %v2321_v20  ;;  %2429 = vmatprep.subr.bf16.mxu0 %v1537_v22  ;;  %v1328_v23 = vpop.permute.xlu0 %1327 }
 0x34f   : > { %2430 = vmatpush3.bf16.msra.mxu0 %v1537_v22 }
 0x350   : > { %v1469_v13 = vadd.f32 %v2323_v18, %v1283_v15  ;;  %v1516_v26 = vmax.f32 %v1466_v25, 0.0 }
 0x352   : > { %v1517_v19 = vmax.f32 %v1469_v13, 0.0  ;;  %v2324_v24 = vpop.f32.mrb[12].mxu1  ;;  %v1333_v13 = vpop.permute.xlu1 %1332 }
 0x353   : > { %v2325_v53 = vpop.f32.mrb[13].mxu1 }
 0x354   : > { %v2326_v14 = vadd.f32 %v2325_v53, %v2324_v24  ;;  %v2327_v27 = vpop.f32.mrb[14].mxu1  ;;  %v1538_v28 = vpack.c.bf16 %v1517_v19, %v1516_v26 }
 0x355   : > { %v2328_v52 = vpop.f32.mrb[15].mxu1 }
 0x356   : > { %v1474_v17 = vadd.f32 %v2326_v14, %v1288_v29  ;;  %v2329_v30 = vadd.f32 %v2328_v52, %v2327_v27  ;;  %2431 = vmatprep.subr.bf16.mxu0 %v1538_v28  ;;  %v2596_v14 = vld [vmem:[#allocation5 + $0x190] ss:$8 sps:$4 sm:$0xff]   ;;  %v2597_v27 = vld [vmem:[#allocation5 + $0x1a0] ss:$8 sps:$4 sm:$0xff]   ;;  %v1555_v52 = vpop.permute.xlu0 %1554 }
 0x357   : > { %2432 = vmatpush3.bf16.msra.mxu0 %v1538_v28  ;;  %v2598_v28 = vld [vmem:[#allocation5 + $0x1b0] ss:$8 sps:$4 sm:$0xff]   ;;  %v2599_v29 = vld [vmem:[#allocation5 + $0x1c0] ss:$8 sps:$4 sm:$0xff]  }
 0x358   : > { %v1477_v32 = vadd.f32 %v2329_v30, %v1293_v56  ;;  %v1518_v63 = vmax.f32 %v1474_v17, 0.0  ;;  %2459 = vmatprep.mubr.msk.bf16.mxu1 %vm1769_vm2, %v2599_v29  ;;  %v1560_v17 = vpop.permute.xlu1 %1559 }
 0x35a   : > { %v1519_v36 = vmax.f32 %v1477_v32, 0.0  ;;  %v2330_v21 = vpop.f32.mrb[16].mxu1  ;;  %v1565_v30 = vpop.permute.xlu0 %1564 }
 0x35b   : > { %v2331_v31 = vpop.f32.mrb[17].mxu1 }
 0x35c   : > { %v2332_v37 = vadd.f32 %v2331_v31, %v2330_v21  ;;  %v2333_v11 = vpop.f32.mrb[18].mxu1  ;;  %v1539_v39 = vpack.c.bf16 %v1519_v36, %v1518_v63  ;;  %v1570_v56 = vpop.permute.xlu1 %1569 }
 0x35d   : > { %v2334_v40 = vpop.f32.mrb[19].mxu1 }
 0x35e   : > { %v1482_v33 = vadd.f32 %v2332_v37, %v1298_v34  ;;  %v2335_v41 = vadd.f32 %v2334_v40, %v2333_v11  ;;  %2433 = vmatprep.subr.bf16.mxu0 %v1539_v39  ;;  %v1575_v21 = vpop.permute.xlu0 %1574 }
 0x35f   : > { %2434 = vmatpush3.bf16.msra.mxu0 %v1539_v39 }
 0x360   : > { %v1485_v43 = vadd.f32 %v2335_v41, %v1303_v42  ;;  %v1520_v44 = vmax.f32 %v1482_v33, 0.0  ;;  %v1580_v34 = vpop.permute.xlu1 %1579 }
 0x362   : > { %v1521_v45 = vmax.f32 %v1485_v43, 0.0  ;;  %v2336_v46 = vpop.f32.mrb[20].mxu1 }
 0x363   : > { %v2337_v47 = vpop.f32.mrb[21].mxu1 }
 0x364   : > { %v2338_v48 = vadd.f32 %v2337_v47, %v2336_v46  ;;  %v2339_v49 = vpop.f32.mrb[22].mxu1  ;;  %v1540_v50 = vpack.c.bf16 %v1521_v45, %v1520_v44  ;;  %v1585_v45 = vpop.permute.xlu0 %1584 }
 0x365   : > { %v2340_v16 = vpop.f32.mrb[23].mxu1 }
 0x366   : > { %v1490_v54 = vadd.f32 %v2338_v48, %v1308_v51  ;;  %v2341_v55 = vadd.f32 %v2340_v16, %v2339_v49  ;;  %2435 = vmatprep.subr.bf16.mxu0 %v1540_v50 }
 0x367   : > { %2436 = vmatpush3.bf16.msra.mxu0 %v1540_v50  ;;  %v1590_v50 = vpop.permute.xlu1 %1589 }
 0x368   : > { %v1493_v57 = vadd.f32 %v2341_v55, %v1313_v1  ;;  %v1522_v60 = vmax.f32 %v1490_v54, 0.0 }
 0x36a   : > { %v1523_v2 = vmax.f32 %v1493_v57, 0.0  ;;  %v2342_v62 = vpop.f32.mrb[24].mxu1 }
 0x36b   : > { %v2343_v58 = vpop.f32.mrb[25].mxu1 }
 0x36c   : > { %v2344_v59 = vadd.f32 %v2343_v58, %v2342_v62  ;;  %v2345_v61 = vpop.f32.mrb[26].mxu1  ;;  %v1541_v0 = vpack.c.bf16 %v1523_v2, %v1522_v60 }
 0x36d   : > { %v2346_v9 = vpop.f32.mrb[27].mxu1 }
 0x36e   : > { %v1498_v4 = vadd.f32 %v2344_v59, %v1318_v3  ;;  %v2347_v5 = vadd.f32 %v2346_v9, %v2345_v61  ;;  %2437 = vmatprep.subr.bf16.mxu0 %v1541_v0  ;;  %v2600_v61 = vld [vmem:[#allocation5 + $0x1d0] ss:$8 sps:$4 sm:$0xff]   ;;  %v2702_v9 = vmov 0.0  }
 0x36f   : > { %2438 = vmatpush3.bf16.msra.mxu0 %v1541_v0  ;;  %v2601_v0 = vld [vmem:[#allocation5 + $0x1e0] ss:$8 sps:$4 sm:$0xff]   ;;  %v2602_v3 = vld [vmem:[#allocation5 + $0x1f0] ss:$8 sps:$4 sm:$0xff]  }
 0x370   : > { %v1501_v10 = vadd.f32 %v2347_v5, %v1323_v7  ;;  %v1524_v8 = vmax.f32 %v1498_v4, 0.0  ;;  %v1712_v4 = vpop.permute.xlu0 %1711  ;;  %v1717_v5 = vpop.permute.xlu1 %1716 }
 0x372   : > { %v1525_v38 = vmax.f32 %v1501_v10, 0.0  ;;  %v2348_v6 = vpop.f32.mrb[28].mxu1 }
 0x373   : > { %v2349_v12 = vpop.f32.mrb[29].mxu1 }
 0x374   : > { %v2350_v20 = vadd.f32 %v2349_v12, %v2348_v6  ;;  %v2351_v22 = vpop.f32.mrb[30].mxu1  ;;  %v1542_v35 = vpack.c.bf16 %v1525_v38, %v1524_v8  ;;  %v1722_v7 = vpop.permute.xlu0 %1721 }
 0x375   : > { %v2352_v25 = vpop.f32.mrb[31].mxu1  ;;  %v1727_v10 = vpop.permute.xlu1 %1726 }
 0x376   : > { %v1506_v18 = vadd.f32 %v2350_v20, %v1328_v23  ;;  %v2353_v15 = vadd.f32 %v2352_v25, %v2351_v22  ;;  %2439 = vmatprep.subr.bf16.mxu0 %v1542_v35 }
 0x377   : > { %2440 = vmatpush3.bf16.msra.mxu0 %v1542_v35 }
 0x378   : > { %v1509_v26 = vadd.f32 %v2353_v15, %v1333_v13  ;;  %v1526_v19 = vmax.f32 %v1506_v18, 0.0  ;;  %v1732_v12 = vpop.permute.xlu0 %1731 }
 0x379   : > { %v1737_v25 = vpop.permute.xlu1 %1736 }
 0x37a   : > { %v1527_v24 = vmax.f32 %v1509_v26, 0.0 }
 0x37c   : > { %v1543_v53 = vpack.c.bf16 %v1527_v24, %v1526_v19 }
 0x37e   : > { %2441 = vmatprep.subr.bf16.mxu0 %v1543_v53 }
 0x37f   : > { %2442 = vmatpush3.bf16.msra.mxu0 %v1543_v53  ;;  %v1742_v53 = vpop.permute.xlu0 %1741 }
 0x380   : > { %2467 = vmatprep.subr.bf16.mxu0 %v2702_v9 }
 0x382   : > { %2444 = vmatmul.mubr.bf16.vlgmr.msra.gmra.mrb[32].mxu0 %v2596_v14 }
 0x383   : > { %2447 = vmatprep.mubr.bf16.mxu0 %v2597_v27 }
 0x38a   : > { %2448 = vmatmul.mubr.bf16.gmra.mrb[36].mxu0 %v2598_v28 }
 0x38b   : > { %2475 = vmatprep.mubr.msk.bf16.mxu0 %vm2703_vm3, %v2702_v9 }
 0x455   : > { %v2445_v32 = vpop.f32.mrb[32].mxu0 }
 0x456   : > { %v1659_v63 = vadd.f32 %v2445_v32, %v1565_v30  ;;  %v1650_v36 = vpop.f32.mrb[33].mxu0 }
 0x457   : > { %v1651_v31 = vadd.f32 %v1650_v36, %v1555_v52  ;;  %v2446_v37 = vpop.f32.mrb[34].mxu0  ;;  %v1747_v52 = vpop.permute.xlu1 %1746 }
 0x458   : > { %v1662_v11 = vadd.f32 %v2446_v37, %v1570_v56  ;;  %v1653_v39 = vpop.f32.mrb[35].mxu0  ;;  %v1683_v33 = vmax.f32 %v1659_v63, 0.0 }
 0x459   : > { %v1654_v40 = vadd.f32 %v1653_v39, %v1560_v17  ;;  %v1681_v42 = vmax.f32 %v1651_v31, 0.0 }
 0x45a   : > { %v1684_v41 = vmax.f32 %v1662_v11, 0.0 }
 0x45b   : > { %v1682_v43 = vmax.f32 %v1654_v40, 0.0 }
 0x45c   : > { %v1698_v44 = vpack.c.bf16 %v1684_v41, %v1683_v33  ;;  %v1866_v33 = vpop.permute.xlu0 %1865 }
 0x45d   : > { %v1697_v46 = vpack.c.bf16 %v1682_v43, %v1681_v42  ;;  %v2449_v47 = vpop.f32.mrb[36].mxu0  ;;  %v1871_v42 = vpop.permute.xlu1 %1870 }
 0x45e   : > { %v1675_v48 = vadd.f32 %v2449_v47, %v1585_v45  ;;  %v1666_v49 = vpop.f32.mrb[37].mxu0 }
 0x45f   : > { %v1667_v51 = vadd.f32 %v1666_v49, %v1575_v21  ;;  %v2450_v16 = vpop.f32.mrb[38].mxu0  ;;  %2451 = vmatprep.subr.bf16.mxu1 %v1697_v46 }
 0x460   : > { %v1678_v54 = vadd.f32 %v2450_v16, %v1590_v50  ;;  %v1669_v55 = vpop.f32.mrb[39].mxu0  ;;  %2452 = vmatpush3.bf16.msra.mxu1 %v1697_v46  ;;  %v1687_v57 = vmax.f32 %v1675_v48, 0.0 }
 0x461   : > { %v1670_v1 = vadd.f32 %v1669_v55, %v1580_v34  ;;  %2453 = vmatprep.subr.bf16.mxu1 %v1698_v44  ;;  %v1685_v2 = vmax.f32 %v1667_v51, 0.0  ;;  %v2603_v34 = vld [vmem:[#allocation5 + $0x200] ss:$8 sps:$4 sm:$0xff]  }
 0x462   : > { %v1688_v60 = vmax.f32 %v1678_v54, 0.0 }
 0x463   : > { %v1686_v62 = vmax.f32 %v1670_v1, 0.0 }
 0x464   : > { %v1700_v58 = vpack.c.bf16 %v1688_v60, %v1687_v57  ;;  %2454 = vmatpush3.bf16.msra.mxu1 %v1698_v44 }
 0x465   : > { %v1699_v59 = vpack.c.bf16 %v1686_v62, %v1685_v2 }
 0x467   : > { %2455 = vmatprep.subr.bf16.mxu1 %v1699_v59 }
 0x468   : > { %2456 = vmatpush3.bf16.msra.mxu1 %v1699_v59 }
 0x469   : > { %2457 = vmatprep.subr.bf16.mxu1 %v1700_v58 }
 0x46c   : > { %2458 = vmatpush3.bf16.msra.mxu1 %v1700_v58 }
 0x46f   : > { %2460 = vmatmul.mubr.msk.bf16.vlgmr.msra.gmra.mrb[32].mxu1 %vm1769_vm2, %v2600_v61 }
 0x470   : > { %2463 = vmatprep.mubr.msk.bf16.mxu1 %vm1769_vm2, %v2601_v0 }
 0x477   : > { %2464 = vmatmul.mubr.msk.bf16.gmra.mrb[36].mxu1 %vm1769_vm2, %v2602_v3 }
 0x542   : > { %v2461_v8 = vpop.f32.mrb[32].mxu1 }
 0x543   : > { %v1825_v38 = vadd.f32 %v2461_v8, %v1722_v7  ;;  %v1816_v6 = vpop.f32.mrb[33].mxu1 }
 0x544   : > { %v1817_v20 = vadd.f32 %v1816_v6, %v1712_v4  ;;  %v2462_v22 = vpop.f32.mrb[34].mxu1 }
 0x545   : > { %v1828_v35 = vadd.f32 %v2462_v22, %v1727_v10  ;;  %v1819_v23 = vpop.f32.mrb[35].mxu1  ;;  %v3370_v15 = vmax.f32 %v1825_v38, 0.0 }
 0x546   : > { %v1820_v18 = vadd.f32 %v1819_v23, %v1717_v5  ;;  %v3374_v26 = vmax.f32 %v1817_v20, 0.0 }
 0x547   : > { %v3372_v13 = vmax.f32 %v1828_v35, 0.0  ;;  %1953 = vst [vmem:[#allocation3 + $0x10] sm:$0xff] (!%p2210_p11), %v3370_v15 }
 0x548   : > { %v3376_v19 = vmax.f32 %v1820_v18, 0.0  ;;  %1951 = vst [vmem:[#allocation3] sm:$0xff] (!%p2210_p11), %v3374_v26 }
 0x549   : > { %v1858_v24 = vpack.c.bf16 %v3372_v13, %v3370_v15  ;;  %1954 = vst [vmem:[#allocation3 + $0x18] sm:$0xff] (!%p2210_p11), %v3372_v13 }
 0x54a   : > { %v1857_v14 = vpack.c.bf16 %v3376_v19, %v3374_v26  ;;  %v2465_v27 = vpop.f32.mrb[36].mxu1  ;;  %1952 = vst [vmem:[#allocation3 + $0x8] sm:$0xff] (!%p2210_p11), %v3376_v19 }
 0x54b   : > { %v1841_v28 = vadd.f32 %v2465_v27, %v1742_v53  ;;  %v1832_v29 = vpop.f32.mrb[37].mxu1 }
 0x54c   : > { %v1833_v17 = vadd.f32 %v1832_v29, %v1732_v12  ;;  %v2466_v30 = vpop.f32.mrb[38].mxu1  ;;  %2468 = vmatpush3.bf16.msra.mxu0 %v1857_v14 }
 0x54d   : > { %v1844_v56 = vadd.f32 %v2466_v30, %v1747_v52  ;;  %v1835_v32 = vpop.f32.mrb[39].mxu1  ;;  %2469 = vmatprep.subr.bf16.mxu0 %v2702_v9  ;;  %v3382_v36 = vmax.f32 %v1841_v28, 0.0 }
 0x54e   : > { %v1836_v63 = vadd.f32 %v1835_v32, %v1737_v25  ;;  %v3386_v31 = vmax.f32 %v1833_v17, 0.0 }
 0x54f   : > { %v3384_v21 = vmax.f32 %v1844_v56, 0.0  ;;  %1957 = vst [vmem:[#allocation3 + $0x30] sm:$0xff] (!%p2210_p11), %v3382_v36 }
 0x550   : > { %v3388_v37 = vmax.f32 %v1836_v63, 0.0  ;;  %2470 = vmatpush3.bf16.msra.mxu0 %v1858_v24  ;;  %1955 = vst [vmem:[#allocation3 + $0x20] sm:$0xff] (!%p2210_p11), %v3386_v31 }
 0x551   : > { %v1860_v11 = vpack.c.bf16 %v3384_v21, %v3382_v36  ;;  %2471 = vmatprep.subr.bf16.mxu0 %v2702_v9  ;;  %1958 = vst [vmem:[#allocation3 + $0x38] sm:$0xff] (!%p2210_p11), %v3384_v21 }
 0x552   : > { %v1859_v39 = vpack.c.bf16 %v3388_v37, %v3386_v31  ;;  %1956 = vst [vmem:[#allocation3 + $0x28] sm:$0xff] (!%p2210_p11), %v3388_v37 }
 0x554   : > { %2472 = vmatpush3.bf16.msra.mxu0 %v1859_v39 }
 0x555   : > { %2473 = vmatprep.subr.bf16.mxu0 %v2702_v9 }
 0x558   : > { %2474 = vmatpush3.bf16.msra.mxu0 %v1860_v11 }
 0x55b   : > { %2476 = vmatmul.mubr.msk.bf16.vlgmr.msra.gmra.mrb[40].mxu0 %vm1769_vm2, %v2603_v34 }
 0x62e   : > { %v1915_v40 = vpop.f32.mrb[40].mxu0 }
 0x62f   : > { %v2477_v41 = vpop.f32.mrb[41].mxu0  ;;  %v1916_v44 = vadd.f32 %v1915_v40, %v1866_v33 }
 0x630   : > { %v1918_v43 = vpop.f32.mrb[42].mxu0 }
 0x631   : > { %v1919_v45 = vadd.f32 %v1918_v43, %v1871_v42  ;;  %v2478_v46 = vpop.f32.mrb[43].mxu0 }
 0x633   : > { %v1922_v47 = vmax.f32 %v1916_v44, %v1919_v45 }
 0x635   : > { %v1923_v48 = vrot.slane %v1922_v47, 4 }
 0x637   : > { %v1924_v49 = vmax.f32 %v1922_v47, %v1923_v48 }
 0x639   : > { %v1925_v50 = vrot.slane %v1924_v49, 2 }
 0x63b   : > { %v1926_v51 = vmax.f32 %v1924_v49, %v1925_v50 }
 0x63d   : > { %v1927_v16 = vrot.slane %v1926_v51, 1 }
 0x63f   : > { %v1928_v54 = vmax.f32 %v1926_v51, %v1927_v16 }
 0x641   : > { %v1929_v55 = vsub.f32 %v1916_v44, %v1928_v54  ;;  %v1930_v1 = vsub.f32 %v1919_v45, %v1928_v54 }
 0x643   : > { %v1931_v57 = vmul.f32 1.442695, %v1929_v55  ;;  %v1933_v60 = vmul.f32 1.442695, %v1930_v1 }
 0x645   : > { %2604 = vpow2.f32 %v1931_v57 }
 0x646   : > { %2606 = vpow2.f32 %v1933_v60 }
 0x64f   : > { %v2605_v2 = vpop.eup %2604 }
 0x650   : > { %v2607_v62 = vpop.eup %2606 }
 0x651   : > { %v1935_v58 = vadd.f32 %v2607_v62, %v2605_v2 }
 0x653   : > { %v1936_v59 = vrot.slane %v1935_v58, 4 }
 0x655   : > { %v1937_v61 = vadd.f32 %v1936_v59, %v1935_v58 }
 0x657   : > { %v1938_v0 = vrot.slane %v1937_v61, 2 }
 0x659   : > { %v1939_v3 = vadd.f32 %v1938_v0, %v1937_v61 }
 0x65b   : > { %v1940_v9 = vrot.slane %v1939_v3, 1 }
 0x65d   : > { %v1941_v4 = vadd.f32 %v1940_v9, %v1939_v3 }
 0x65f   : > { %2608 = vlog2.f32 %v1941_v4 }
 0x668   : > { %1950 = sbr.rel (%p2210_p11) target bundleno = 1647 (0x66f), region = 90 }
 0x669   : > { %v2609_v5 = vpop.eup %2608 }
 0x66a   : > { %v1943_v7 = vmul.f32 0.6931472, %v2609_v5 }
 0x66c   : > { %v1944_v10 = vsub.f32 %v1929_v55, %v1943_v7  ;;  %v1945_v8 = vsub.f32 %v1930_v1, %v1943_v7 }
 0x66e   : > { %1946 = vst [vmem:[%s2881_s12] sm:$0xff] %v1944_v10  ;;  %1947 = vst [vmem:[%s2881_s12 + $0x8] sm:$0x3] %v1945_v8 }
 0x66f PF: > { %p2259_p13 = scmp.eq.s32.totalorder %s2680_s23, 0 }
 0x670   : > { %v1963_v38 = vld [vmem:[#allocation3] sm:$0xff] (!%p2259_p13)  ;;  %v1964_v6 = vld [vmem:[#allocation3 + $0x8] sm:$0xff] (!%p2259_p13)  ;;  %v1965_v12 = vld [vmem:[#allocation3 + $0x10] sm:$0xff] (!%p2259_p13) }
 0x671   : > { %1962 = sbr.rel (%p2259_p13) target bundleno = 1656 (0x678), region = 94  ;;  %v1971_v20 = vmax.f32 (!%p2259_p13), %v1963_v38, %v3374_v26  ;;  %v1972_v22 = vmax.f32 (!%p2259_p13), %v1964_v6, %v3376_v19  ;;  %v1973_v35 = vmax.f32 (!%p2259_p13), %v1965_v12, %v3370_v15  ;;  %v1966_v23 = vld [vmem:[#allocation3 + $0x18] sm:$0xff] (!%p2259_p13)  ;;  %v1967_v25 = vld [vmem:[#allocation3 + $0x20] sm:$0xff] (!%p2259_p13)  ;;  %v1968_v18 = vld [vmem:[#allocation3 + $0x28] sm:$0xff] (!%p2259_p13) }
 0x672   : > { %v1974_v24 = vmax.f32 (!%p2259_p13), %v1966_v23, %v3372_v13  ;;  %v1975_v53 = vmax.f32 (!%p2259_p13), %v1967_v25, %v3386_v31  ;;  %v1976_v14 = vmax.f32 (!%p2259_p13), %v1968_v18, %v3388_v37  ;;  %v1969_v27 = vld [vmem:[#allocation3 + $0x30] sm:$0xff] (!%p2259_p13)  ;;  %v1970_v28 = vld [vmem:[#allocation3 + $0x38] sm:$0xff] (!%p2259_p13) }
 0x673   : > { %1979 = vst [vmem:[#allocation3] sm:$0xff] (!%p2259_p13), %v1971_v20  ;;  %1980 = vst [vmem:[#allocation3 + $0x8] sm:$0xff] (!%p2259_p13), %v1972_v22  ;;  %v1977_v26 = vmax.f32 (!%p2259_p13), %v1969_v27, %v3382_v36  ;;  %v1978_v19 = vmax.f32 (!%p2259_p13), %v1970_v28, %v3384_v21 }
 0x674   : > { %1981 = vst [vmem:[#allocation3 + $0x10] sm:$0xff] (!%p2259_p13), %v1973_v35  ;;  %1982 = vst [vmem:[#allocation3 + $0x18] sm:$0xff] (!%p2259_p13), %v1974_v24 }
 0x675   : > { %1983 = vst [vmem:[#allocation3 + $0x20] sm:$0xff] (!%p2259_p13), %v1975_v53  ;;  %1984 = vst [vmem:[#allocation3 + $0x28] sm:$0xff] (!%p2259_p13), %v1976_v14 }
 0x676   : > { %1985 = vst [vmem:[#allocation3 + $0x30] sm:$0xff] (!%p2259_p13), %v1977_v26  ;;  %1986 = vst [vmem:[#allocation3 + $0x38] sm:$0xff] (!%p2259_p13), %v1978_v19 }
 0x678 PF: > { %p2260_p1 = scmp.ne.s32.totalorder %s2680_s23, 2 }
 0x679   : > { %vm2015_vm4 = vcmask (!%p2260_p1), 7168  }
 0x67a   : > { %1990 = sbr.rel (%p2260_p1) target bundleno = 1815 (0x717), region = 98  ;;  %v1991_v13 = vld [vmem:[#allocation3] sm:$0xff] (!%p2260_p1)  ;;  %v1992_v52 = vld [vmem:[#allocation3 + $0x8] sm:$0xff] (!%p2260_p1) }
 0x67b   : > { %v1993_v15 = vld [vmem:[#allocation3 + $0x10] sm:$0xff] (!%p2260_p1)  ;;  %1999 = vmax.xlane.f32.xlu0 (!%p2260_p1), %v1991_v13  ;;  %v1994_v29 = vld [vmem:[#allocation3 + $0x18] sm:$0xff] (!%p2260_p1) }
 0x67c   : > { %2003 = vmax.xlane.f32.xlu1 (!%p2260_p1), %v1993_v15  ;;  %v1996_v17 = vld [vmem:[#allocation3 + $0x28] sm:$0xff] (!%p2260_p1)  ;;  %v1995_v30 = vld [vmem:[#allocation3 + $0x20] sm:$0xff] (!%p2260_p1) }
 0x67d   : > { %v1998_v56 = vld [vmem:[#allocation3 + $0x38] sm:$0xff] (!%p2260_p1)  ;;  %v1997_v32 = vld [vmem:[#allocation3 + $0x30] sm:$0xff] (!%p2260_p1) }
 0x67f   : > { %2001 = vmax.xlane.f32.xlu0 (!%p2260_p1), %v1992_v52 }
 0x680   : > { %2005 = vmax.xlane.f32.xlu1 (!%p2260_p1), %v1994_v29 }
 0x683   : > { %2007 = vmax.xlane.f32.xlu0 %v1995_v30 }
 0x684   : > { %2009 = vmax.xlane.f32.xlu1 %v1996_v17 }
 0x687   : > { %2011 = vmax.xlane.f32.xlu0 %v1997_v32 }
 0x688   : > { %2013 = vmax.xlane.f32.xlu1 %v1998_v56 }
 0x708   : > { %v2000_v36 = vpop.xlane.xlu0 %1999 }
 0x709   : > { %v2004_v63 = vpop.xlane.xlu1 %2003  ;;  %2016 = vst.msk [vmem:[%s2879_s7] sm:$0xff] %vm2015_vm4, %v2000_v36 }
 0x70a   : > { %2018 = vst.msk [vmem:[%s2879_s7 + $0x10] sm:$0xff] %vm2015_vm4, %v2004_v63 }
 0x70c   : > { %v2002_v31 = vpop.xlane.xlu0 %2001 }
 0x70d   : > { %v2006_v21 = vpop.xlane.xlu1 %2005  ;;  %2017 = vst.msk [vmem:[%s2879_s7 + $0x8] sm:$0xff] %vm2015_vm4, %v2002_v31 }
 0x70e   : > { %2019 = vst.msk [vmem:[%s2879_s7 + $0x18] sm:$0xff] %vm2015_vm4, %v2006_v21 }
 0x710   : > { %v2008_v11 = vpop.xlane.xlu0 %2007 }
 0x711   : > { %v2010_v37 = vpop.xlane.xlu1 %2009  ;;  %2020 = vst.msk [vmem:[%s2879_s7 + $0x20] sm:$0xff] %vm2015_vm4, %v2008_v11 }
 0x712   : > { %2021 = vst.msk [vmem:[%s2879_s7 + $0x28] sm:$0xff] %vm2015_vm4, %v2010_v37 }
 0x714   : > { %v2012_v34 = vpop.xlane.xlu0 %2011 }
 0x715   : > { %v2014_v39 = vpop.xlane.xlu1 %2013  ;;  %2022 = vst.msk [vmem:[%s2879_s7 + $0x30] sm:$0xff] %vm2015_vm4, %v2012_v34 }
 0x716   : > { %2023 = vst.msk [vmem:[%s2879_s7 + $0x38] sm:$0xff] %vm2015_vm4, %v2014_v39 }
 0x717 PF: > { %p3486_p3 = scmp.ne.s32.totalorder %s3478_s10, 0 }
 0x718   : > { %s2480_s8 = smul.u32 (%p3486_p3), 6, %s2684_s24  ;;  %v2069_v40 = vld [vmem:[%s2881_s12] sm:$0xff] (%p3486_p3)  ;;  %v2071_v33 = vld [vmem:[%s2881_s12 + $0x8] sm:$0xff] (%p3486_p3) }
 0x719   : > { %2035 = sbr.rel (!%p3486_p3) target bundleno = 1824 (0x720), region = 102 }
 0x71a   : > { %s2037_s13 = sadd.s32 (%p3486_p3), %s2680_s23, %s2480_s8 }
 0x71b   : > { %s2262_s11 = sshll.u32 (%p3486_p3), %s2037_s13, 3 }
 0x71c   : > { %s2039_s14 = scalar_lea.vmem (%p3486_p3), %s3468_s5, %s2262_s11 }
 0x71d   : > { %2070 = vst [vmem:[%s2039_s14] sm:$0xff] (%p3486_p3), %v2069_v40  ;;  %2072 = vst [vmem:[%s2039_s14 + $0x18] sm:$0xff] (%p3486_p3), %v2071_v33 }
 0x720 PF: > { %s18_s27 = sadd.s32 1, %s2696_s27   ;;  %s3487_s10 = sld [smem:[#allocation11_spill]] }
 0x721   : > { %p15_p4 = scmp.ge.s32.totalorder %s18_s27, 8   ;;  %s3488_s7 = sld [smem:[#allocation9_spill]] }
 0x722   : > { %s3489_s16 = sld [smem:[#allocation10_spill]]  ;;  %s3490_s21 = smov %s2676_s22 }
 0x723   : > { %s3492_s23 = smov %s2688_s25  ;;  %s3493_s24 = smov %s2692_s26 }
 0x724   :  { %17 = sbr.rel (!%p15_p4) target bundleno = 4 (0x4), region = 187 }
 0x726   : > { %s3491_s22 = smov %s3487_s10 }
 0x727   : > { %s3494_s25 = smov %s3488_s7 }
 0x728   : > { %s3495_s26 = smov %s3489_s16 }
 0x72b   :  { %2099 = vsyncpa [#allocation6], 1 }
 0x72c   :  { %2101 = vsyncpa [#allocation6 + $0x1], 1 }

</bundles_post_ra>
